<compile_context>
chip_gen: v5e
topology: v5e:2x2
jax: 0.10.0
libtpu: 0.0.40
codegen_flags: <defaults>
</compile_context>

<pallas_src>
import functools

import jax
import jax.numpy as jnp
from jax.experimental import pallas as pl
from jax.experimental.pallas import tpu as pltpu


def _conv_dw_kernel(x_ref, wdw_ref, b1_ref, wpw_ref, b2_ref, o_ref,
                    *, stride, H, Wo, TH):
    """One (batch, row-tile) step of the fused conv_dw block.

    x_ref  : (1, H, W, Cin)       full unpadded image of this batch element
                                  (resident across row tiles).
    wdw_ref: (9, Cin)             depthwise weights with BN1 scale pre-folded.
    b1_ref : (1, Cin)             BN1 bias (beta - mean*scale).
    wpw_ref: (Cin, Cout_p) bf16   pointwise weights with BN2 scale pre-folded.
    b2_ref : (1, Cout_p)          BN2 bias.
    o_ref  : (1, TH, Wo, Cout_p)  output row tile (lane-dense channel axis).
    """
    cin = x_ref.shape[-1]
    r = pl.program_id(1)

    # ---- build the zero-padded input window for this row tile (in VMEM) ----
    th_in = (TH - 1) * stride + 3            # input rows needed (incl. halo)
    row0_in = r * (TH * stride) - 1          # first needed input row (may be -1)

    # middle rows of the window are always in bounds
    mid = x_ref[0, pl.ds(row0_in + 1, th_in - 2), :, :]

    # first / last window rows may fall into the zero padding
    top_src = jnp.maximum(row0_in, 0)
    top = x_ref[0, pl.ds(top_src, 1), :, :]
    top = top * (row0_in >= 0).astype(jnp.float32)

    row_last = row0_in + th_in - 1
    bot_src = jnp.minimum(row_last, H - 1)
    bot = x_ref[0, pl.ds(bot_src, 1), :, :]
    bot = bot * (row_last < H).astype(jnp.float32)

    xw = jnp.concatenate([top, mid, bot], axis=0)            # (th_in, W, Cin)
    zcol = jnp.zeros((th_in, 1, cin), jnp.float32)
    xw = jnp.concatenate([zcol, xw, zcol], axis=1)           # (th_in, W+2, Cin)

    # ---- depthwise 3x3 conv (VPU shift-and-accumulate), BN1 scale folded ----
    wdw = wdw_ref[...]                                       # (9, Cin) resident
    acc = None

    if stride == 1:
        for kh in range(3):
            for kw in range(3):
                patch = xw[kh:kh + TH, kw:kw + Wo, :]
                term = patch * wdw[3 * kh + kw][None, None, :]
                acc = term if acc is None else acc + term
    else:  # stride == 2: 4-phase decomposition -> every tap is a dense slice
        xe = xw[:, 0::2, :]                                  # even columns
        xo = xw[:, 1::2, :]                                  # odd columns
        phases = ((xe[0::2], xo[0::2]),                      # even window rows
                  (xe[1::2], xo[1::2]))                      # odd window rows
        for kh in range(3):
            for kw in range(3):
                ph = phases[kh % 2][kw % 2]
                patch = ph[kh // 2:kh // 2 + TH, kw // 2:kw // 2 + Wo, :]
                term = patch * wdw[3 * kh + kw][None, None, :]
                acc = term if acc is None else acc + term

    # ---- BN1 bias + ReLU ----
    y1 = jnp.maximum(acc + b1_ref[0][None, None, :], 0.0)    # (TH, Wo, Cin)

    # ---- pointwise 1x1 conv on the MXU (bf16 inputs, f32 accumulate) ----
    y1 = y1.reshape(TH * Wo, cin).astype(jnp.bfloat16)
    y2 = jnp.dot(y1, wpw_ref[...], preferred_element_type=jnp.float32)

    # ---- BN2 bias + ReLU ----
    y2 = jnp.maximum(y2 + b2_ref[...], 0.0)                  # (TH*Wo, Cout_p)

    o_ref[0] = y2.reshape(TH, Wo, -1).astype(o_ref.dtype)


def _pick_row_tile(Ho, Wo):
    """Largest divisor TH of Ho with TH*Wo <= ~2048 (good MXU row count,
    modest per-tile VMEM).  Falls back to 1 (always a divisor)."""
    cap = max(1, 2048 // max(Wo, 1))
    best = 1
    for d in range(1, Ho + 1):
        if Ho % d == 0 and d <= cap:
            best = d
    return best


def mobilenet_conv_dw(x_nchw, params, stride):
    """params: w_dw (3,3,Cin), bn1_*, w_pw (Cin,Cout), bn2_* (eval-mode BN)."""
    eps = 1e-5
    w_dw = params["w_dw"].astype(jnp.float32)                # (3, 3, Cin)
    w_pw = params["w_pw"].astype(jnp.float32)                # (Cin, Cout)
    cin = w_dw.shape[-1]
    cout = w_pw.shape[-1]

    # Fold BatchNorm (running stats) into weights + a per-channel bias.
    s1 = params["bn1_gamma"] / jnp.sqrt(params["bn1_var"] + eps)
    b1 = params["bn1_beta"] - params["bn1_mean"] * s1
    s2 = params["bn2_gamma"] / jnp.sqrt(params["bn2_var"] + eps)
    b2 = params["bn2_beta"] - params["bn2_mean"] * s2

    wdw_f = (w_dw * s1[None, None, :]).reshape(9, cin).astype(jnp.float32)
    b1 = b1.reshape(1, cin).astype(jnp.float32)

    # Lane-dense output channels: pad Cout up to a multiple of 128.
    cout_p = ((cout + 127) // 128) * 128
    wpw_f = (w_pw * s2[None, :]).astype(jnp.float32)
    wpw_f = jnp.pad(wpw_f, ((0, 0), (0, cout_p - cout))).astype(jnp.bfloat16)
    b2 = jnp.pad(b2.astype(jnp.float32), (0, cout_p - cout)).reshape(1, cout_p)

    # NCHW -> NHWC (channels on the lane axis). No spatial HBM padding:
    # the kernel zero-pads its row-tile window directly in VMEM.
    x = jnp.transpose(x_nchw, (0, 2, 3, 1)).astype(jnp.float32)
    B, H, W, _ = x.shape
    Ho = (H - 1) // stride + 1                               # == (H+2-3)//s + 1
    Wo = (W - 1) // stride + 1

    TH = _pick_row_tile(Ho, Wo)
    nH = Ho // TH

    kernel = functools.partial(_conv_dw_kernel, stride=stride, H=H, Wo=Wo, TH=TH)

    out_nhwc = pl.pallas_call(
        kernel,
        out_shape=jax.ShapeDtypeStruct((B, Ho, Wo, cout_p), jnp.float32),
        grid_spec=pltpu.PrefetchScalarGridSpec(
            num_scalar_prefetch=0,
            grid=(B, nH),
            in_specs=[
                # Full image per batch element: block index depends only on b,
                # so it is DMA'd once per batch element and stays resident
                # while the output row tiles stream through the pipeline.
                pl.BlockSpec((1, H, W, cin), lambda b, r: (b, 0, 0, 0)),
                pl.BlockSpec((9, cin), lambda b, r: (0, 0)),
                pl.BlockSpec((1, cin), lambda b, r: (0, 0)),
                pl.BlockSpec((cin, cout_p), lambda b, r: (0, 0)),
                pl.BlockSpec((1, cout_p), lambda b, r: (0, 0)),
            ],
            out_specs=pl.BlockSpec((1, TH, Wo, cout_p),
                                   lambda b, r: (b, r, 0, 0)),
        ),
        compiler_params=pltpu.CompilerParams(
            dimension_semantics=("parallel", "parallel")),
    )(x, wdw_f, b1, wpw_f, b2)

    # Drop channel padding, back to NCHW to match the PyTorch convention.
    out_nhwc = out_nhwc[..., :cout]
    return jnp.transpose(out_nhwc, (0, 3, 1, 2))


def _reference(x_nchw, params, stride):
    """Pure-JAX reference (NCHW, f32, same semantics) for correctness check."""
    eps = 1e-5
    cin = params["w_dw"].shape[-1]
    w_dw_oihw = jnp.transpose(params["w_dw"], (2, 0, 1))[:, None, :, :]
    y = jax.lax.conv_general_dilated(
        x_nchw, w_dw_oihw, window_strides=(stride, stride),
        padding=((1, 1), (1, 1)), feature_group_count=cin,
        dimension_numbers=("NCHW", "OIHW", "NCHW"))
    s1 = params["bn1_gamma"] / jnp.sqrt(params["bn1_var"] + eps)
    b1 = params["bn1_beta"] - params["bn1_mean"] * s1
    y = jnp.maximum(y * s1[None, :, None, None] + b1[None, :, None, None], 0.0)
    w_pw_oihw = jnp.transpose(params["w_pw"], (1, 0))[:, :, None, None]
    y = jax.lax.conv_general_dilated(
        y, w_pw_oihw, window_strides=(1, 1), padding="VALID",
        dimension_numbers=("NCHW", "OIHW", "NCHW"))
    s2 = params["bn2_gamma"] / jnp.sqrt(params["bn2_var"] + eps)
    b2 = params["bn2_beta"] - params["bn2_mean"] * s2
    y = jnp.maximum(y * s2[None, :, None, None] + b2[None, :, None, None], 0.0)
    return y


if __name__ == "__main__":
    key = jax.random.PRNGKey(0)
    B, inp, oup, H, W = 2, 4, 8, 16, 16

    ks = jax.random.split(key, 8)
    params = {
        "w_dw": jax.random.normal(ks[0], (3, 3, inp), jnp.float32) * 0.1,
        "bn1_gamma": jax.random.normal(ks[1], (inp,), jnp.float32) * 0.1 + 1.0,
        "bn1_beta": jax.random.normal(ks[2], (inp,), jnp.float32) * 0.1,
        "bn1_mean": jax.random.normal(ks[3], (inp,), jnp.float32) * 0.1,
        "bn1_var": jnp.abs(jax.random.normal(ks[4], (inp,), jnp.float32)) * 0.5 + 0.5,
        "w_pw": jax.random.normal(ks[5], (inp, oup), jnp.float32) * 0.1,
        "bn2_gamma": jax.random.normal(ks[6], (oup,), jnp.float32) * 0.1 + 1.0,
        "bn2_beta": jax.random.normal(ks[7], (oup,), jnp.float32) * 0.1,
        "bn2_mean": jnp.zeros((oup,), jnp.float32),
        "bn2_var": jnp.ones((oup,), jnp.float32),
    }

    x = jax.random.normal(jax.random.PRNGKey(42), (B, inp, H, W), jnp.float32)

    for stride in (1, 2):
        out = jax.block_until_ready(mobilenet_conv_dw(x, params, stride))
        ref = jax.block_until_ready(_reference(x, params, stride))
        ho = (H - 1) // stride + 1
        assert out.shape == ref.shape == (B, oup, ho, ho), (out.shape, ref.shape)
        # bf16 MXU inputs (f32 accumulation) -> allow ~1e-2 tolerance.
        max_err = float(jnp.max(jnp.abs(out - ref)))
        assert jnp.allclose(out, ref, atol=1e-2, rtol=1e-2), (
            f"mismatch vs reference (stride={stride}), max abs err {max_err:e}")

    print("KERNEL_OK")
</pallas_src>

<mosaic_0001>
module attributes {stable_mosaic.version = 11 : i64} {
  func.func @_conv_dw_kernel(%arg0: i32, %arg1: i32, %arg2: memref<1x16x16x4xf32, #tpu.memory_space<vmem>>, %arg3: memref<9x4xf32, #tpu.memory_space<vmem>>, %arg4: memref<1x4xf32, #tpu.memory_space<vmem>>, %arg5: memref<4x128xbf16, #tpu.memory_space<vmem>>, %arg6: memref<1x128xf32, #tpu.memory_space<vmem>>, %arg7: memref<1x16x16x128xf32, #tpu.memory_space<vmem>>) attributes {dimension_semantics = [#tpu.dimension_semantics<parallel>, #tpu.dimension_semantics<parallel>], iteration_bounds = array<i64: 2, 1>, scalar_prefetch = 0 : i64, scratch_operands = 0 : i64, tpu.core_type = #tpu.core_type<tc>, window_params = [{transform_indices = @transform_0, window_bounds = array<i64: 1, 16, 16, 4>}, {pipeline_mode = #tpu.pipeline_mode<synchronous>, transform_indices = @transform_1, window_bounds = array<i64: 9, 4>}, {pipeline_mode = #tpu.pipeline_mode<synchronous>, transform_indices = @transform_2, window_bounds = array<i64: 1, 4>}, {pipeline_mode = #tpu.pipeline_mode<synchronous>, transform_indices = @transform_3, window_bounds = array<i64: 4, 128>}, {pipeline_mode = #tpu.pipeline_mode<synchronous>, transform_indices = @transform_4, window_bounds = array<i64: 1, 128>}, {transform_indices = @transform_5, window_bounds = array<i64: 1, 16, 16, 128>}]} {
    %c16_i32 = arith.constant 16 : i32
    %0 = arith.muli %arg1, %c16_i32 : i32
    %c1_i32 = arith.constant 1 : i32
    %1 = arith.subi %0, %c1_i32 : i32
    %c1_i32_0 = arith.constant 1 : i32
    %2 = arith.addi %1, %c1_i32_0 : i32
    %c0 = arith.constant 0 : index
    %3 = arith.index_cast %2 : i32 to index
    %c0_1 = arith.constant 0 : index
    %c0_2 = arith.constant 0 : index
    %4 = vector.load %arg2[%c0, %3, %c0_1, %c0_2] : memref<1x16x16x4xf32, #tpu.memory_space<vmem>>, vector<1x16x16x4xf32>
    %5 = vector.shape_cast %4 : vector<1x16x16x4xf32> to vector<16x16x4xf32>
    %c0_i32 = arith.constant 0 : i32
    %6 = arith.maxsi %1, %c0_i32 : i32
    %c0_3 = arith.constant 0 : index
    %7 = arith.index_cast %6 : i32 to index
    %c0_4 = arith.constant 0 : index
    %c0_5 = arith.constant 0 : index
    %8 = vector.load %arg2[%c0_3, %7, %c0_4, %c0_5] : memref<1x16x16x4xf32, #tpu.memory_space<vmem>>, vector<1x1x16x4xf32>
    %9 = vector.shape_cast %8 : vector<1x1x16x4xf32> to vector<1x16x4xf32>
    %c0_i32_6 = arith.constant 0 : i32
    %10 = arith.cmpi sge, %1, %c0_i32_6 : i32
    %11 = arith.extui %10 : i1 to i32
    %12 = arith.sitofp %11 : i32 to f32
    %13 = vector.broadcast %12 : f32 to vector<1x16x4xf32>
    %14 = arith.mulf %9, %13 : vector<1x16x4xf32>
    %c18_i32 = arith.constant 18 : i32
    %15 = arith.addi %1, %c18_i32 : i32
    %c1_i32_7 = arith.constant 1 : i32
    %16 = arith.subi %15, %c1_i32_7 : i32
    %c15_i32 = arith.constant 15 : i32
    %17 = arith.minsi %16, %c15_i32 : i32
    %c0_8 = arith.constant 0 : index
    %18 = arith.index_cast %17 : i32 to index
    %c0_9 = arith.constant 0 : index
    %c0_10 = arith.constant 0 : index
    %19 = vector.load %arg2[%c0_8, %18, %c0_9, %c0_10] : memref<1x16x16x4xf32, #tpu.memory_space<vmem>>, vector<1x1x16x4xf32>
    %20 = vector.shape_cast %19 : vector<1x1x16x4xf32> to vector<1x16x4xf32>
    %c16_i32_11 = arith.constant 16 : i32
    %21 = arith.cmpi slt, %16, %c16_i32_11 : i32
    %22 = arith.extui %21 : i1 to i32
    %23 = arith.sitofp %22 : i32 to f32
    %24 = vector.broadcast %23 : f32 to vector<1x16x4xf32>
    %25 = arith.mulf %20, %24 : vector<1x16x4xf32>
    %26 = tpu.concatenate %14, %5, %25 in 0 : vector<1x16x4xf32>, vector<16x16x4xf32>, vector<1x16x4xf32> -> vector<18x16x4xf32>
    %cst = arith.constant 0.000000e+00 : f32
    %27 = vector.broadcast %cst : f32 to vector<18x1x4xf32>
    %28 = tpu.concatenate %27, %26, %27 in 1 : vector<18x1x4xf32>, vector<18x16x4xf32>, vector<18x1x4xf32> -> vector<18x18x4xf32>
    %c0_12 = arith.constant 0 : index
    %c0_13 = arith.constant 0 : index
    %29 = vector.load %arg3[%c0_12, %c0_13] : memref<9x4xf32, #tpu.memory_space<vmem>>, vector<9x4xf32>
    %30 = vector.extract_strided_slice %28 {offsets = [0, 0, 0], sizes = [16, 16, 4], strides = [1, 1, 1]} : vector<18x18x4xf32> to vector<16x16x4xf32>
    %31 = vector.extract_strided_slice %29 {offsets = [0, 0], sizes = [1, 4], strides = [1, 1]} : vector<9x4xf32> to vector<1x4xf32>
    %32 = vector.shape_cast %31 : vector<1x4xf32> to vector<4xf32>
    %33 = vector.shape_cast %32 : vector<4xf32> to vector<1x1x4xf32>
    %34 = vector.broadcast %33 : vector<1x1x4xf32> to vector<16x16x4xf32>
    %35 = arith.mulf %30, %34 : vector<16x16x4xf32>
    %36 = vector.extract_strided_slice %28 {offsets = [0, 1, 0], sizes = [16, 16, 4], strides = [1, 1, 1]} : vector<18x18x4xf32> to vector<16x16x4xf32>
    %37 = vector.extract_strided_slice %29 {offsets = [1, 0], sizes = [1, 4], strides = [1, 1]} : vector<9x4xf32> to vector<1x4xf32>
    %38 = vector.shape_cast %37 : vector<1x4xf32> to vector<4xf32>
    %39 = vector.shape_cast %38 : vector<4xf32> to vector<1x1x4xf32>
    %40 = vector.broadcast %39 : vector<1x1x4xf32> to vector<16x16x4xf32>
    %41 = arith.mulf %36, %40 : vector<16x16x4xf32>
    %42 = arith.addf %35, %41 : vector<16x16x4xf32>
    %43 = vector.extract_strided_slice %28 {offsets = [0, 2, 0], sizes = [16, 16, 4], strides = [1, 1, 1]} : vector<18x18x4xf32> to vector<16x16x4xf32>
    %44 = vector.extract_strided_slice %29 {offsets = [2, 0], sizes = [1, 4], strides = [1, 1]} : vector<9x4xf32> to vector<1x4xf32>
    %45 = vector.shape_cast %44 : vector<1x4xf32> to vector<4xf32>
    %46 = vector.shape_cast %45 : vector<4xf32> to vector<1x1x4xf32>
    %47 = vector.broadcast %46 : vector<1x1x4xf32> to vector<16x16x4xf32>
    %48 = arith.mulf %43, %47 : vector<16x16x4xf32>
    %49 = arith.addf %42, %48 : vector<16x16x4xf32>
    %50 = vector.extract_strided_slice %28 {offsets = [1, 0, 0], sizes = [16, 16, 4], strides = [1, 1, 1]} : vector<18x18x4xf32> to vector<16x16x4xf32>
    %51 = vector.extract_strided_slice %29 {offsets = [3, 0], sizes = [1, 4], strides = [1, 1]} : vector<9x4xf32> to vector<1x4xf32>
    %52 = vector.shape_cast %51 : vector<1x4xf32> to vector<4xf32>
    %53 = vector.shape_cast %52 : vector<4xf32> to vector<1x1x4xf32>
    %54 = vector.broadcast %53 : vector<1x1x4xf32> to vector<16x16x4xf32>
    %55 = arith.mulf %50, %54 : vector<16x16x4xf32>
    %56 = arith.addf %49, %55 : vector<16x16x4xf32>
    %57 = vector.extract_strided_slice %28 {offsets = [1, 1, 0], sizes = [16, 16, 4], strides = [1, 1, 1]} : vector<18x18x4xf32> to vector<16x16x4xf32>
    %58 = vector.extract_strided_slice %29 {offsets = [4, 0], sizes = [1, 4], strides = [1, 1]} : vector<9x4xf32> to vector<1x4xf32>
    %59 = vector.shape_cast %58 : vector<1x4xf32> to vector<4xf32>
    %60 = vector.shape_cast %59 : vector<4xf32> to vector<1x1x4xf32>
    %61 = vector.broadcast %60 : vector<1x1x4xf32> to vector<16x16x4xf32>
    %62 = arith.mulf %57, %61 : vector<16x16x4xf32>
    %63 = arith.addf %56, %62 : vector<16x16x4xf32>
    %64 = vector.extract_strided_slice %28 {offsets = [1, 2, 0], sizes = [16, 16, 4], strides = [1, 1, 1]} : vector<18x18x4xf32> to vector<16x16x4xf32>
    %65 = vector.extract_strided_slice %29 {offsets = [5, 0], sizes = [1, 4], strides = [1, 1]} : vector<9x4xf32> to vector<1x4xf32>
    %66 = vector.shape_cast %65 : vector<1x4xf32> to vector<4xf32>
    %67 = vector.shape_cast %66 : vector<4xf32> to vector<1x1x4xf32>
    %68 = vector.broadcast %67 : vector<1x1x4xf32> to vector<16x16x4xf32>
    %69 = arith.mulf %64, %68 : vector<16x16x4xf32>
    %70 = arith.addf %63, %69 : vector<16x16x4xf32>
    %71 = vector.extract_strided_slice %28 {offsets = [2, 0, 0], sizes = [16, 16, 4], strides = [1, 1, 1]} : vector<18x18x4xf32> to vector<16x16x4xf32>
    %72 = vector.extract_strided_slice %29 {offsets = [6, 0], sizes = [1, 4], strides = [1, 1]} : vector<9x4xf32> to vector<1x4xf32>
    %73 = vector.shape_cast %72 : vector<1x4xf32> to vector<4xf32>
    %74 = vector.shape_cast %73 : vector<4xf32> to vector<1x1x4xf32>
    %75 = vector.broadcast %74 : vector<1x1x4xf32> to vector<16x16x4xf32>
    %76 = arith.mulf %71, %75 : vector<16x16x4xf32>
    %77 = arith.addf %70, %76 : vector<16x16x4xf32>
    %78 = vector.extract_strided_slice %28 {offsets = [2, 1, 0], sizes = [16, 16, 4], strides = [1, 1, 1]} : vector<18x18x4xf32> to vector<16x16x4xf32>
    %79 = vector.extract_strided_slice %29 {offsets = [7, 0], sizes = [1, 4], strides = [1, 1]} : vector<9x4xf32> to vector<1x4xf32>
    %80 = vector.shape_cast %79 : vector<1x4xf32> to vector<4xf32>
    %81 = vector.shape_cast %80 : vector<4xf32> to vector<1x1x4xf32>
    %82 = vector.broadcast %81 : vector<1x1x4xf32> to vector<16x16x4xf32>
    %83 = arith.mulf %78, %82 : vector<16x16x4xf32>
    %84 = arith.addf %77, %83 : vector<16x16x4xf32>
    %85 = vector.extract_strided_slice %28 {offsets = [2, 2, 0], sizes = [16, 16, 4], strides = [1, 1, 1]} : vector<18x18x4xf32> to vector<16x16x4xf32>
    %86 = vector.extract_strided_slice %29 {offsets = [8, 0], sizes = [1, 4], strides = [1, 1]} : vector<9x4xf32> to vector<1x4xf32>
    %87 = vector.shape_cast %86 : vector<1x4xf32> to vector<4xf32>
    %88 = vector.shape_cast %87 : vector<4xf32> to vector<1x1x4xf32>
    %89 = vector.broadcast %88 : vector<1x1x4xf32> to vector<16x16x4xf32>
    %90 = arith.mulf %85, %89 : vector<16x16x4xf32>
    %91 = arith.addf %84, %90 : vector<16x16x4xf32>
    %c0_14 = arith.constant 0 : index
    %c0_15 = arith.constant 0 : index
    %92 = vector.load %arg4[%c0_14, %c0_15] : memref<1x4xf32, #tpu.memory_space<vmem>>, vector<1x4xf32>
    %93 = vector.shape_cast %92 : vector<1x4xf32> to vector<4xf32>
    %94 = vector.shape_cast %93 : vector<4xf32> to vector<1x1x4xf32>
    %95 = vector.broadcast %94 : vector<1x1x4xf32> to vector<16x16x4xf32>
    %96 = arith.addf %91, %95 : vector<16x16x4xf32>
    %cst_16 = arith.constant 0.000000e+00 : f32
    %97 = vector.broadcast %cst_16 : f32 to vector<16x16x4xf32>
    %98 = arith.maximumf %96, %97 : vector<16x16x4xf32>
    %99 = vector.shape_cast %98 : vector<16x16x4xf32> to vector<256x4xf32>
    %100 = arith.truncf %99 : vector<256x4xf32> to vector<256x4xbf16>
    %c0_17 = arith.constant 0 : index
    %c0_18 = arith.constant 0 : index
    %101 = vector.load %arg5[%c0_17, %c0_18] : memref<4x128xbf16, #tpu.memory_space<vmem>>, vector<4x128xbf16>
    %cst_19 = arith.constant dense<0.000000e+00> : vector<256x128xf32>
    %102 = tpu.matmul %100, %101, %cst_19 {dimension_numbers = #tpu.dot_dimension_numbers<[1], [0], [0], [1], [0, 0, 1, 1], [], []>} : vector<256x4xbf16>, vector<4x128xbf16>, vector<256x128xf32> -> vector<256x128xf32>
    %c0_20 = arith.constant 0 : index
    %c0_21 = arith.constant 0 : index
    %103 = vector.load %arg6[%c0_20, %c0_21] : memref<1x128xf32, #tpu.memory_space<vmem>>, vector<1x128xf32>
    %104 = vector.broadcast %103 : vector<1x128xf32> to vector<256x128xf32>
    %105 = arith.addf %102, %104 : vector<256x128xf32>
    %cst_22 = arith.constant 0.000000e+00 : f32
    %106 = vector.broadcast %cst_22 : f32 to vector<256x128xf32>
    %107 = arith.maximumf %105, %106 : vector<256x128xf32>
    %108 = vector.shape_cast %107 : vector<256x128xf32> to vector<16x16x128xf32>
    %c0_23 = arith.constant 0 : index
    %c0_24 = arith.constant 0 : index
    %c0_25 = arith.constant 0 : index
    %c0_26 = arith.constant 0 : index
    %109 = vector.load %arg7[%c0_23, %c0_24, %c0_25, %c0_26] : memref<1x16x16x128xf32, #tpu.memory_space<vmem>>, vector<1x16x16x128xf32>
    %110 = vector.shape_cast %109 : vector<1x16x16x128xf32> to vector<16x16x128xf32>
    %111 = vector.shape_cast %108 : vector<16x16x128xf32> to vector<1x16x16x128xf32>
    tpu.vector_store %arg7[%c0_23, %c0_24, %c0_25, %c0_26], %111 {strides = array<i32>} : memref<1x16x16x128xf32, #tpu.memory_space<vmem>>, vector<1x16x16x128xf32>,
    return
  }
  func.func @transform_0(%arg0: i32, %arg1: i32) -> (i32, i32, i32, i32) {
    %c0_i32 = arith.constant 0 : i32
    %c0_i32_0 = arith.constant 0 : i32
    %c0_i32_1 = arith.constant 0 : i32
    %c0_i32_2 = arith.constant 0 : i32
    return %arg0, %c0_i32, %c0_i32_0, %c0_i32_1 : i32, i32, i32, i32
  }
  func.func @transform_1(%arg0: i32, %arg1: i32) -> (i32, i32) {
    %c0_i32 = arith.constant 0 : i32
    %c0_i32_0 = arith.constant 0 : i32
    %c0_i32_1 = arith.constant 0 : i32
    return %c0_i32, %c0_i32_0 : i32, i32
  }
  func.func @transform_2(%arg0: i32, %arg1: i32) -> (i32, i32) {
    %c0_i32 = arith.constant 0 : i32
    %c0_i32_0 = arith.constant 0 : i32
    %c0_i32_1 = arith.constant 0 : i32
    return %c0_i32, %c0_i32_0 : i32, i32
  }
  func.func @transform_3(%arg0: i32, %arg1: i32) -> (i32, i32) {
    %c0_i32 = arith.constant 0 : i32
    %c0_i32_0 = arith.constant 0 : i32
    %c0_i32_1 = arith.constant 0 : i32
    return %c0_i32, %c0_i32_0 : i32, i32
  }
  func.func @transform_4(%arg0: i32, %arg1: i32) -> (i32, i32) {
    %c0_i32 = arith.constant 0 : i32
    %c0_i32_0 = arith.constant 0 : i32
    %c0_i32_1 = arith.constant 0 : i32
    return %c0_i32, %c0_i32_0 : i32, i32
  }
  func.func @transform_5(%arg0: i32, %arg1: i32) -> (i32, i32, i32, i32) {
    %c0_i32 = arith.constant 0 : i32
    %c0_i32_0 = arith.constant 0 : i32
    %c0_i32_1 = arith.constant 0 : i32
    return %arg0, %arg1, %c0_i32, %c0_i32_0 : i32, i32, i32, i32
  }
}

</mosaic_0001>

<bundles_post_ra>
// kernel: tpu_custom_call.1
= control target key start
LH: loop header
LB: loop body
LE: loop exit
PB: predicated region body
PF: predicated region fallthrough
CT: control target
= control target key end

     0   :  { %10 = vsyncpa [#allocation3], 0  ;;  %s4132_s0 = inlined_call_operand.vmem [shape: f32[2,16,16,4], index: 0, kind: input, shape index: {}]   ;;  %s4133_s1 = inlined_call_operand.vmem [shape: f32[9,4], index: 1, kind: input, shape index: {}]   ;;  %s4134_s2 = inlined_call_operand.vmem [shape: f32[1,4], index: 2, kind: input, shape index: {}]   ;;  %s4135_s3 = inlined_call_operand.vmem [shape: bf16[4,128], index: 3, kind: input, shape index: {}]   ;;  %s4136_s4 = inlined_call_operand.vmem [shape: f32[1,128], index: 4, kind: input, shape index: {}]   ;;  %s4137_s5 = inlined_call_operand.hbm [shape: f32[2,16,16,128], index: 5, kind: output, shape index: {}]  }
   0x1   :  { %12 = vsyncpa [#allocation3 + $0x1], 0  ;;  %s2699_s18 = smov 0   ;;  %s2701_s19 = smov 0  }
   0x2   :  { %s2703_s20 = smov 0   ;;  %s2705_s21 = smov 0  }
   0x3   :  { %s2707_s22 = smov 0   ;;  %s2709_s23 = smov 0  }
   0x4 LB: > { %s2487_s24 = sadd.s32 4294967295, %s2665_s23   ;;  %s2488_s25 = sadd.s32 4294967294, %s2665_s23   ;;  %s2665_s23 = sphi %s2709_s23, %s18_s23   ;;  %s2661_s22 = sphi %s2707_s22, %s4200_s22   ;;  %s2657_s21 = sphi %s2705_s21, %s4199_s21   ;;  %s2653_s20 = sphi %s2703_s20, %s4198_s20   ;;  %s2649_s19 = sphi %s2701_s19, %s4197_s19   ;;  %s2645_s18 = sphi %s2699_s18, %s4196_s18  }
   0x5   : > { %s30_s26 = sadd.s32 1, %s2661_s22  ;;  %s149_s27 = sadd.s32 1, %s2653_s20 }
   0x6   : > { %p32_p0 = scmp.ge.s32.totalorder %s30_s26, 2  ;;  %p159_p1 = scmp.ne.s32.totalorder %s2653_s20, %s2649_s19 }
   0x7   : > { %p160_p2 = scmp.eq.s32.totalorder %s2487_s24, 1  ;;  %p165_p3 = scmp.ne.s32.totalorder %s2649_s19, %s2645_s18 }
   0x8   : > { %s4202_s26 = smov (%p32_p0, %s30_s26), 0  ;;  %p166_p5 = scmp.eq.s32.totalorder %s2488_s25, 1 }
   0x9   : > { %p2739_p4 = por %p160_p2, %p159_p1  ;;  %s144_s29 = ssub.s32 %s2661_s22, %s4202_s26 }
   0xa   : > { %p2491_p6 = scmp.ge.s32.totalorder %s2665_s23, 1  ;;  %p147_p7 = scmp.eq.s32.totalorder %s144_s29, 0 }
   0xb   : > { %p2746_p8 = por %p166_p5, %p165_p3  ;;  %p204_p9 = scmp.lt.s32.totalorder %s2665_s23, 3 }
   0xc   : > { %s2752_s6 = scalar_select %p147_p7, %s2653_s20, %s149_s27  }
   0xd   : > { %p205_p10 = pnand %p2491_p6, %p204_p9 }
   0xf   : > { %208 = sbr.rel (%p205_p10) target bundleno = 501 (0x1f5), region = 40 }
  0x14   : > { %v2178_v0 = vld [vmem:[%s4135_s3] sm:$0x3]  ;;  %vm2232_vm0 = vcmask 1041408   ;;  %p232_p11 = scmp.lt.s32.totalorder %s2657_s21, 1  ;;  %vm336_vm1 = vcmask 1040384   ;;  %vm613_vm2 = vcmask 1046528  }
  0x15   : > { %v2234_v1 = vsel %vm2232_vm0, %v2178_v0, 0  ;;  %v481_v2 = vld [vmem:[%s4133_s1] sm:$0xff]  ;;  %vm855_vm3 = vcmask 1045504   ;;  %vm2183_vm4 = vcmask 31744   ;;  %s229_s13 = sand.u32 1, %s2649_s19   ;;  %s2519_s24 = sshll.u32 %s2657_s21, 8 }
  0x16   : > { %2520 = vmatpush.bf16.msra.mxu1 %v2234_v1  ;;  %2521 = vmatpush.bf16.msra.mxu2 %v2234_v1  ;;  %s233_s11 = scalar_select %p232_p11, %s2657_s21, 1  ;;  %v2762_v3 = vperm.slane %v481_v2, 0  ;;  %v2764_v4 = vperm.slane %v481_v2, 1  ;;  %v2771_v5 = vperm.slane %v481_v2, 2  ;;  %v2773_v6 = vperm.slane %v481_v2, 3 }
  0x17   : > { %2522 = vmatpush.bf16.msra.mxu3 %v2234_v1  ;;  %2243 = vmatpush.bf16.msra.mxu0 %v2234_v1  ;;  %v2778_v10 = vperm.slane %v481_v2, 4  ;;  %v2780_v11 = vperm.slane %v481_v2, 5  ;;  %v2782_v12 = vperm.slane %v481_v2, 6  ;;  %v2787_v22 = vperm.slane %v481_v2, 7  ;;  %s2492_s16 = sshll.u32 %s229_s13, 8  ;;  %s2404_s29 = scalar_lea.hbm %s4137_s5, %s2519_s24 }
  0x18   : > { %s2518_s12 = sshll.u32 %s233_s11, 8  ;;  %s4024_s17 = scalar_lea.vmem [#allocation2], %s2492_s16 }
  0x19   : > { %s2769_s15 = scalar_lea.vmem %s4132_s0, %s2518_s12  ;;  %s2405_s7 = sshll.u32 %s4024_s17, 4  ;;  %s2406_s7 = int_to_ptr.vmem [resolvable:$true] %s2405_s7 }
  0x1a   : > { %v249_v7 = vld [vmem:[%s2769_s15 + $0x30] sm:$0xff]  ;;  %v250_v8 = vld [vmem:[%s2769_s15 + $0x38] sm:$0xff]  ;;  %v251_v9 = vld [vmem:[%s2769_s15 + $0x40] sm:$0xff]  ;;  %s2407_s8 = sshll.u32 %s2404_s29, 4  ;;  %s2390_s9 = scalar_lea.sflag [#allocation3], %s229_s13  ;;  %s2408_s8 = int_to_ptr.hbm [resolvable:$true] %s2407_s8 }
  0x1b   : > { %v252_v13 = vld [vmem:[%s2769_s15 + $0x48] sm:$0xff]  ;;  %v253_v14 = vld [vmem:[%s2769_s15 + $0x50] sm:$0xff]  ;;  %v254_v15 = vld [vmem:[%s2769_s15 + $0x58] sm:$0xff]  ;;  %v349_v16 = vrot.slane %v249_v7, 7  ;;  %v350_v17 = vrot.slane %v250_v8, 7  ;;  %v352_v18 = vrot.slane %v251_v9, 7 }
  0x1c   : > { %v353_v19 = vrot.slane %v252_v13, 7  ;;  %v355_v20 = vrot.slane %v253_v14, 7  ;;  %v356_v21 = vrot.slane %v254_v15, 7  ;;  %v2857_v7 = vld [vmem:[%s4133_s1 + $0x8] ss:$0 sm:$0xff]  ;;  %s2601_s10 = sshra.s32 %s2408_s8, 4  ;;  %s2602_s10 = int_to_ptr.hbm [resolvable:$true] %s2601_s10 }
  0x1d   : > { %v2790_v23 = vsel %vm336_vm1, %v349_v16, %v350_v17  ;;  %v2793_v24 = vsel %vm336_vm1, 0.0, %v349_v16  ;;  %v2796_v25 = vsel %vm336_vm1, 0.0, %v352_v18  ;;  %v2799_v26 = vsel %vm336_vm1, %v350_v17, 0.0  ;;  %s2603_s21 = scalar_lea.hbm %s2602_s10, 256  ;;  %s2607_s14 = scalar_lea.hbm %s4137_s5, 512 }
  0x1e   : > { %4168 = vst [vmem:[#allocation5_spill] sm:$0xff] %v2790_v23  ;;  %v2802_v27 = vsel %vm336_vm1, %v352_v18, %v353_v19  ;;  %v2805_v28 = vsel %vm336_vm1, %v355_v20, %v356_v21  ;;  %v2808_v29 = vsel %vm336_vm1, 0.0, %v355_v20  ;;  %v2811_v30 = vsel %vm336_vm1, %v353_v19, 0.0  ;;  %p2604_p12 = scmp.ne.s32.totalorder %s2602_s10, %s2603_s21  ;;  %p2608_p1 = scmp.lt.s32.totalorder %s2602_s10, %s4137_s5 }
  0x1f   : > { %4169 = vst [vmem:[#allocation6_spill] sm:$0xff] %v2793_v24  ;;  %v2814_v31 = vsel %vm336_vm1, %v356_v21, 0.0  ;;  %v492_v32 = vmul.f32 %v2762_v3, %v2793_v24  ;;  %v493_v33 = vmul.f32 %v2762_v3, %v2790_v23  ;;  %v529_v34 = vmul.f32 %v2764_v4, %v2793_v24  ;;  %p2609_p2 = scmp.lt.s32.totalorder %s2607_s14, %s2603_s21 }
  0x20   : > { %4170 = vst [vmem:[#allocation7_spill] sm:$0xff] %v2796_v25  ;;  %v530_v35 = vmul.f32 %v2764_v4, %v2790_v23  ;;  %v531_v36 = vmul.f32 %v2764_v4, %v2799_v26  ;;  %v771_v37 = vmul.f32 %v2771_v5, %v2793_v24  ;;  %v772_v38 = vmul.f32 %v2771_v5, %v2790_v23  ;;  %p2605_p13 = pnand %p2604_p12, %p2739_p4 }
  0x21   : > { %4171 = vst [vmem:[#allocation8_spill] sm:$0xff] %v2799_v26  ;;  %v634_v39 = vrot.slane %v529_v34, 1  ;;  %v773_v40 = vmul.f32 %v2771_v5, %v2799_v26  ;;  %v1009_v41 = vmul.f32 %v2773_v6, %v2796_v25  ;;  %v1010_v42 = vmul.f32 %v2773_v6, %v2802_v27  ;;  %p2610_p3 = por %p2609_p2, %p2608_p1 }
  0x22   : > { %4172 = vst [vmem:[#allocation9_spill] sm:$0xff] %v2802_v27  ;;  %v635_v43 = vrot.slane %v530_v35, 1  ;;  %v637_v44 = vrot.slane %v531_v36, 1  ;;  %v876_v45 = vrot.slane %v771_v37, 2  ;;  %v877_v46 = vrot.slane %v772_v38, 2  ;;  %p2606_p0 = pneg %p2605_p13 }
  0x23   : > { %4173 = vst [vmem:[#allocation10_spill] sm:$0xff] %v2811_v30  ;;  %v879_v47 = vrot.slane %v773_v40, 2  ;;  %v1078_v48 = vmul.f32 %v2778_v10, %v2796_v25  ;;  %v1079_v49 = vmul.f32 %v2778_v10, %v2802_v27  ;;  %v1080_v50 = vmul.f32 %v2778_v10, %v2811_v30 }
  0x24   : > { %v636_v51 = vsel %vm613_vm2, %v634_v39, %v635_v43  ;;  %v638_v52 = vsel %vm613_vm2, %v635_v43, %v637_v44  ;;  %v878_v53 = vsel %vm855_vm3, %v876_v45, %v877_v46  ;;  %v1319_v54 = vmul.f32 %v2780_v11, %v2796_v25  ;;  %v259_v43 = vld [vmem:[%s2769_s15 + $0x80] sm:$0xff]  ;;  %p2611_p5 = pnand %p2610_p3, %p2606_p0 }
  0x25   : > { %v734_v55 = vadd.f32 %v636_v51, %v492_v32  ;;  %v735_v56 = vadd.f32 %v638_v52, %v493_v33  ;;  %v880_v57 = vsel %vm855_vm3, %v877_v46, %v879_v47  ;;  %v1182_v58 = vrot.slane %v1078_v48, 1  ;;  %v257_v33 = vld [vmem:[%s2769_s15 + $0x70] sm:$0xff]  ;;  %v260_v47 = vld [vmem:[%s2769_s15 + $0x88] sm:$0xff] }
  0x26   : > { %v1183_v59 = vrot.slane %v1079_v49, 1  ;;  %v1185_v60 = vrot.slane %v1080_v50, 1  ;;  %v1320_v61 = vmul.f32 %v2780_v11, %v2802_v27  ;;  %v1321_v62 = vmul.f32 %v2780_v11, %v2811_v30  ;;  %v261_v48 = vld [vmem:[%s2769_s15 + $0x90] sm:$0xff] }
  0x27   : > { %v976_v63 = vadd.f32 %v878_v53, %v734_v55  ;;  %v977_v0 = vadd.f32 %v880_v57, %v735_v56  ;;  %v1423_v1 = vrot.slane %v1319_v54, 2  ;;  %v1556_v2 = vmul.f32 %v2782_v12, %v2808_v29  ;;  %v262_v54 = vld [vmem:[%s2769_s15 + $0x98] sm:$0xff] }
  0x28   : > { %v1184_v8 = vsel %vm613_vm2, %v1182_v58, %v1183_v59  ;;  %v1186_v9 = vsel %vm613_vm2, %v1183_v59, %v1185_v60  ;;  %v1424_v13 = vrot.slane %v1320_v61, 2  ;;  %v1426_v14 = vrot.slane %v1321_v62, 2 }
  0x29   : > { %v1041_v15 = vadd.f32 %v1009_v41, %v976_v63  ;;  %v1042_v16 = vadd.f32 %v1010_v42, %v977_v0  ;;  %v1557_v17 = vmul.f32 %v2782_v12, %v2805_v28  ;;  %v1625_v18 = vmul.f32 %v2787_v22, %v2808_v29  ;;  %v258_v42 = vld [vmem:[%s2769_s15 + $0x78] sm:$0xff] }
  0x2a   : > { %v1425_v19 = vsel %vm855_vm3, %v1423_v1, %v1424_v13  ;;  %v1427_v20 = vsel %vm855_vm3, %v1424_v13, %v1426_v14  ;;  %v1626_v21 = vmul.f32 %v2787_v22, %v2805_v28  ;;  %v1627_v32 = vmul.f32 %v2787_v22, %v2814_v31  ;;  %v2890_v1 = vld [vmem:[%s4134_s2] ss:$0 sm:$0xff] }
  0x2b   : > { %v1282_v34 = vadd.f32 %v1184_v8, %v1041_v15  ;;  %v1283_v35 = vadd.f32 %v1186_v9, %v1042_v16  ;;  %v1729_v36 = vrot.slane %v1625_v18, 1  ;;  %v1866_v37 = vmul.f32 %v2857_v7, %v2808_v29 }
  0x2c   : > { %v1730_v38 = vrot.slane %v1626_v21, 1  ;;  %v1732_v39 = vrot.slane %v1627_v32, 1  ;;  %v1867_v40 = vmul.f32 %v2857_v7, %v2805_v28  ;;  %v1868_v41 = vmul.f32 %v2857_v7, %v2814_v31 }
  0x2d   : > { %v1523_v44 = vadd.f32 %v1425_v19, %v1282_v34  ;;  %v1524_v45 = vadd.f32 %v1427_v20, %v1283_v35  ;;  %v1970_v46 = vrot.slane %v1866_v37, 2  ;;  %v361_v49 = vrot.slane %v257_v33, 7 }
  0x2e   : > { %v1731_v50 = vsel %vm613_vm2, %v1729_v36, %v1730_v38  ;;  %v1733_v51 = vsel %vm613_vm2, %v1730_v38, %v1732_v39  ;;  %v1971_v52 = vrot.slane %v1867_v40, 2  ;;  %v1973_v53 = vrot.slane %v1868_v41, 2 }
  0x2f   : > { %v1588_v55 = vadd.f32 %v1556_v2, %v1523_v44  ;;  %v1589_v56 = vadd.f32 %v1557_v17, %v1524_v45  ;;  %v362_v57 = vrot.slane %v258_v42, 7  ;;  %v364_v58 = vrot.slane %v259_v43, 7 }
  0x30   : > { %v1972_v59 = vsel %vm855_vm3, %v1970_v46, %v1971_v52  ;;  %v1974_v60 = vsel %vm855_vm3, %v1971_v52, %v1973_v53  ;;  %v365_v61 = vrot.slane %v260_v47, 7  ;;  %v367_v62 = vrot.slane %v261_v48, 7 }
  0x31   : > { %v1829_v63 = vadd.f32 %v1731_v50, %v1588_v55  ;;  %v1830_v0 = vadd.f32 %v1733_v51, %v1589_v56  ;;  %v2893_v8 = vsel %vm336_vm1, %v361_v49, %v362_v57  ;;  %v368_v2 = vrot.slane %v262_v54, 7 }
  0x32   : > { %v2896_v9 = vsel %vm336_vm1, %v364_v58, %v365_v61  ;;  %v2899_v13 = vsel %vm336_vm1, 0.0, %v361_v49  ;;  %v2902_v14 = vsel %vm336_vm1, 0.0, %v364_v58  ;;  %v2905_v15 = vsel %vm336_vm1, 0.0, %v367_v62 }
  0x33   : > { %4174 = vst [vmem:[#allocation11_spill] sm:$0xff] %v2896_v9  ;;  %v2070_v16 = vadd.f32 %v1972_v59, %v1829_v63  ;;  %v2071_v17 = vadd.f32 %v1974_v60, %v1830_v0  ;;  %v2908_v18 = vsel %vm336_vm1, %v367_v62, %v368_v2  ;;  %v2911_v19 = vsel %vm336_vm1, %v362_v57, 0.0 }
  0x34   : > { %v2914_v20 = vsel %vm336_vm1, %v365_v61, 0.0  ;;  %v2917_v21 = vsel %vm336_vm1, %v368_v2, 0.0  ;;  %v500_v32 = vmul.f32 %v2762_v3, %v2899_v13  ;;  %v501_v33 = vmul.f32 %v2762_v3, %v2893_v8 }
  0x35   : > { %4175 = vst [vmem:[#allocation12_spill] sm:$0xff] %v2914_v20  ;;  %v2106_v34 = vadd.f32 %v2890_v1, %v2070_v16  ;;  %v2107_v35 = vadd.f32 %v2890_v1, %v2071_v17  ;;  %v541_v36 = vmul.f32 %v2764_v4, %v2899_v13  ;;  %v542_v37 = vmul.f32 %v2764_v4, %v2893_v8 }
  0x36   : > { %v543_v38 = vmul.f32 %v2764_v4, %v2911_v19  ;;  %v783_v39 = vmul.f32 %v2771_v5, %v2899_v13  ;;  %v784_v40 = vmul.f32 %v2771_v5, %v2893_v8  ;;  %v785_v41 = vmul.f32 %v2771_v5, %v2911_v19 }
  0x37   : > { %v2138_v42 = vmax.f32 %v2106_v34, 0.0  ;;  %v2139_v43 = vmax.f32 %v2107_v35, 0.0  ;;  %v654_v44 = vrot.slane %v541_v36, 1  ;;  %v655_v45 = vrot.slane %v542_v37, 1 }
  0x38   : > { %v657_v46 = vrot.slane %v543_v38, 1  ;;  %v896_v47 = vrot.slane %v783_v39, 2  ;;  %v897_v48 = vrot.slane %v784_v40, 2  ;;  %v899_v49 = vrot.slane %v785_v41, 2 }
  0x39   : > { %v2166_v50 = vpack.c.bf16 %v2139_v43, %v2138_v42  ;;  %v656_v51 = vsel %vm613_vm2, %v654_v44, %v655_v45  ;;  %v1017_v52 = vmul.f32 %v2773_v6, %v2902_v14  ;;  %v1018_v53 = vmul.f32 %v2773_v6, %v2896_v9 }
  0x3a   : > { %v658_v54 = vsel %vm613_vm2, %v655_v45, %v657_v46  ;;  %v742_v55 = vadd.f32 %v656_v51, %v500_v32  ;;  %v898_v56 = vsel %vm855_vm3, %v896_v47, %v897_v48  ;;  %v900_v57 = vsel %vm855_vm3, %v897_v48, %v899_v49 }
  0x3b   : > { %2501 = vmatmul.msk.bf16.vlgmr.msra.gmra.mxu1 %vm2183_vm4, %v2166_v50  ;;  %v743_v58 = vadd.f32 %v658_v54, %v501_v33  ;;  %v1090_v59 = vmul.f32 %v2778_v10, %v2902_v14  ;;  %v1091_v60 = vmul.f32 %v2778_v10, %v2896_v9  ;;  %v1092_v61 = vmul.f32 %v2778_v10, %v2914_v20  ;;  %v265_v54 = vld [vmem:[%s2769_s15 + $0xb0] sm:$0xff] }
  0x3c   : > { %v984_v62 = vadd.f32 %v898_v56, %v742_v55  ;;  %v1331_v63 = vmul.f32 %v2780_v11, %v2902_v14  ;;  %v1332_v0 = vmul.f32 %v2780_v11, %v2896_v9  ;;  %v1333_v2 = vmul.f32 %v2780_v11, %v2914_v20 }
  0x3d   : > { %v985_v16 = vadd.f32 %v900_v57, %v743_v58  ;;  %v1202_v17 = vrot.slane %v1090_v59, 1  ;;  %v1203_v32 = vrot.slane %v1091_v60, 1  ;;  %v1205_v33 = vrot.slane %v1092_v61, 1  ;;  %v266_v59 = vld [vmem:[%s2769_s15 + $0xb8] sm:$0xff] }
  0x3e   : > { %v1049_v34 = vadd.f32 %v1017_v52, %v984_v62  ;;  %v1443_v35 = vrot.slane %v1331_v63, 2  ;;  %v1444_v36 = vrot.slane %v1332_v0, 2  ;;  %v1446_v37 = vrot.slane %v1333_v2, 2  ;;  %v267_v0 = vld [vmem:[%s2769_s15 + $0xc0] sm:$0xff]  ;;  %v268_v2 = vld [vmem:[%s2769_s15 + $0xc8] sm:$0xff] }
  0x3f   : > { %v1050_v38 = vadd.f32 %v1018_v53, %v985_v16  ;;  %v1204_v39 = vsel %vm613_vm2, %v1202_v17, %v1203_v32  ;;  %v1206_v40 = vsel %vm613_vm2, %v1203_v32, %v1205_v33  ;;  %v1564_v41 = vmul.f32 %v2782_v12, %v2905_v15  ;;  %v269_v16 = vld [vmem:[%s2769_s15 + $0xd0] sm:$0xff] }
  0x40   : > { %v1290_v42 = vadd.f32 %v1204_v39, %v1049_v34  ;;  %v1445_v43 = vsel %vm855_vm3, %v1443_v35, %v1444_v36  ;;  %v1447_v44 = vsel %vm855_vm3, %v1444_v36, %v1446_v37  ;;  %v1565_v45 = vmul.f32 %v2782_v12, %v2908_v18  ;;  %v270_v34 = vld [vmem:[%s2769_s15 + $0xd8] sm:$0xff] }
  0x41   : > { %v1291_v46 = vadd.f32 %v1206_v40, %v1050_v38  ;;  %v1637_v47 = vmul.f32 %v2787_v22, %v2905_v15  ;;  %v1638_v48 = vmul.f32 %v2787_v22, %v2908_v18  ;;  %v1639_v49 = vmul.f32 %v2787_v22, %v2917_v21 }
  0x42   : > { %v1531_v50 = vadd.f32 %v1445_v43, %v1290_v42  ;;  %v1878_v51 = vmul.f32 %v2857_v7, %v2905_v15  ;;  %v1879_v52 = vmul.f32 %v2857_v7, %v2908_v18  ;;  %v1880_v53 = vmul.f32 %v2857_v7, %v2917_v21 }
  0x43   : > { %v1532_v55 = vadd.f32 %v1447_v44, %v1291_v46  ;;  %v1749_v56 = vrot.slane %v1637_v47, 1  ;;  %v1750_v57 = vrot.slane %v1638_v48, 1  ;;  %v1752_v58 = vrot.slane %v1639_v49, 1 }
  0x44   : > { %v1596_v60 = vadd.f32 %v1564_v41, %v1531_v50  ;;  %v1990_v61 = vrot.slane %v1878_v51, 2  ;;  %v1991_v62 = vrot.slane %v1879_v52, 2  ;;  %v1993_v63 = vrot.slane %v1880_v53, 2 }
  0x45   : > { %v1597_v17 = vadd.f32 %v1565_v45, %v1532_v55  ;;  %v1751_v32 = vsel %vm613_vm2, %v1749_v56, %v1750_v57  ;;  %v1753_v33 = vsel %vm613_vm2, %v1750_v57, %v1752_v58  ;;  %v373_v35 = vrot.slane %v265_v54, 7 }
  0x46   : > { %v1837_v36 = vadd.f32 %v1751_v32, %v1596_v60  ;;  %v1992_v37 = vsel %vm855_vm3, %v1990_v61, %v1991_v62  ;;  %v1994_v38 = vsel %vm855_vm3, %v1991_v62, %v1993_v63  ;;  %v374_v39 = vrot.slane %v266_v59, 7 }
  0x47   : > { %v1838_v40 = vadd.f32 %v1753_v33, %v1597_v17  ;;  %v376_v41 = vrot.slane %v267_v0, 7  ;;  %v377_v42 = vrot.slane %v268_v2, 7  ;;  %v379_v43 = vrot.slane %v269_v16, 7 }
  0x48   : > { %v2078_v44 = vadd.f32 %v1992_v37, %v1837_v36  ;;  %v2989_v46 = vsel %vm336_vm1, %v373_v35, %v374_v39  ;;  %v380_v45 = vrot.slane %v270_v34, 7  ;;  %v2992_v47 = vsel %vm336_vm1, 0.0, %v373_v35 }
  0x49   : > { %4176 = vst [vmem:[#allocation13_spill] sm:$0xff] %v2989_v46  ;;  %v2079_v48 = vadd.f32 %v1994_v38, %v1838_v40  ;;  %v2995_v49 = vsel %vm336_vm1, %v376_v41, %v377_v42  ;;  %v2998_v50 = vsel %vm336_vm1, 0.0, %v376_v41  ;;  %v3001_v51 = vsel %vm336_vm1, 0.0, %v379_v43 }
  0x4a   : > { %4177 = vst [vmem:[#allocation14_spill] sm:$0xff] %v2992_v47  ;;  %v2114_v52 = vadd.f32 %v2890_v1, %v2078_v44  ;;  %v3005_v53 = vsel %vm336_vm1, %v379_v43, %v380_v45  ;;  %v3008_v54 = vsel %vm336_vm1, %v374_v39, 0.0  ;;  %v3011_v55 = vsel %vm336_vm1, %v377_v42, 0.0 }
  0x4b   : > { %4178 = vst [vmem:[#allocation15_spill] sm:$0xff] %v2995_v49  ;;  %v2115_v56 = vadd.f32 %v2890_v1, %v2079_v48  ;;  %v3015_v57 = vsel %vm336_vm1, %v380_v45, 0.0  ;;  %v508_v58 = vmul.f32 %v2762_v3, %v2992_v47  ;;  %v509_v59 = vmul.f32 %v2762_v3, %v2989_v46 }
  0x4c   : > { %4179 = vst [vmem:[#allocation16_spill] sm:$0xff] %v2998_v50  ;;  %v2146_v60 = vmax.f32 %v2114_v52, 0.0  ;;  %v553_v61 = vmul.f32 %v2764_v4, %v2992_v47  ;;  %v554_v62 = vmul.f32 %v2764_v4, %v2989_v46  ;;  %v555_v63 = vmul.f32 %v2764_v4, %v3008_v54 }
  0x4d   : > { %4180 = vst [vmem:[#allocation17_spill] sm:$0xff] %v3008_v54  ;;  %v2147_v0 = vmax.f32 %v2115_v56, 0.0  ;;  %v795_v2 = vmul.f32 %v2771_v5, %v2992_v47  ;;  %v796_v16 = vmul.f32 %v2771_v5, %v2989_v46  ;;  %v797_v17 = vmul.f32 %v2771_v5, %v3008_v54 }
  0x4e   : > { %4181 = vst [vmem:[#allocation18_spill] sm:$0xff] %v3011_v55  ;;  %v674_v32 = vrot.slane %v553_v61, 1  ;;  %v675_v33 = vrot.slane %v554_v62, 1  ;;  %v677_v34 = vrot.slane %v555_v63, 1  ;;  %v1025_v35 = vmul.f32 %v2773_v6, %v2998_v50 }
  0x4f   : > { %v2170_v36 = vpack.c.bf16 %v2147_v0, %v2146_v60  ;;  %v916_v37 = vrot.slane %v795_v2, 2  ;;  %v917_v38 = vrot.slane %v796_v16, 2  ;;  %v919_v39 = vrot.slane %v797_v17, 2 }
  0x50   : > { %v676_v40 = vsel %vm613_vm2, %v674_v32, %v675_v33  ;;  %v678_v41 = vsel %vm613_vm2, %v675_v33, %v677_v34  ;;  %v1026_v42 = vmul.f32 %v2773_v6, %v2995_v49  ;;  %v1102_v43 = vmul.f32 %v2778_v10, %v2998_v50 }
  0x51   : > { %2505 = vmatmul.msk.bf16.vlgmr.msra.gmra.mxu2 %vm2183_vm4, %v2170_v36  ;;  %v750_v44 = vadd.f32 %v676_v40, %v508_v58  ;;  %v751_v45 = vadd.f32 %v678_v41, %v509_v59  ;;  %v918_v48 = vsel %vm855_vm3, %v916_v37, %v917_v38  ;;  %v920_v52 = vsel %vm855_vm3, %v917_v38, %v919_v39 }
  0x52   : > { %v1103_v56 = vmul.f32 %v2778_v10, %v2995_v49  ;;  %v1104_v60 = vmul.f32 %v2778_v10, %v3011_v55  ;;  %v1222_v61 = vrot.slane %v1102_v43, 1  ;;  %v1343_v62 = vmul.f32 %v2780_v11, %v2998_v50 }
  0x53   : > { %v992_v63 = vadd.f32 %v918_v48, %v750_v44  ;;  %v993_v0 = vadd.f32 %v920_v52, %v751_v45  ;;  %v1344_v58 = vmul.f32 %v2780_v11, %v2995_v49  ;;  %v1345_v59 = vmul.f32 %v2780_v11, %v3011_v55 }
  0x54   : > { %v1223_v2 = vrot.slane %v1103_v56, 1  ;;  %v1225_v16 = vrot.slane %v1104_v60, 1  ;;  %v1463_v17 = vrot.slane %v1343_v62, 2  ;;  %v1572_v32 = vmul.f32 %v2782_v12, %v3001_v51 }
  0x55   : > { %v1057_v33 = vadd.f32 %v1025_v35, %v992_v63  ;;  %v1058_v34 = vadd.f32 %v1026_v42, %v993_v0  ;;  %v1464_v36 = vrot.slane %v1344_v58, 2  ;;  %v1466_v37 = vrot.slane %v1345_v59, 2  ;;  %v243_v42 = vld [vmem:[%s2769_s15] sm:$0xff]  ;;  %v244_v58 = vld [vmem:[%s2769_s15 + $0x8] sm:$0xff] }
  0x56   : > { %v1224_v38 = vsel %vm613_vm2, %v1222_v61, %v1223_v2  ;;  %v1226_v39 = vsel %vm613_vm2, %v1223_v2, %v1225_v16  ;;  %v1573_v40 = vmul.f32 %v2782_v12, %v3005_v53  ;;  %v1649_v41 = vmul.f32 %v2787_v22, %v3001_v51 }
  0x57   : > { %v1298_v43 = vadd.f32 %v1224_v38, %v1057_v33  ;;  %v1299_v44 = vadd.f32 %v1226_v39, %v1058_v34  ;;  %v1465_v45 = vsel %vm855_vm3, %v1463_v17, %v1464_v36  ;;  %v1467_v35 = vsel %vm855_vm3, %v1464_v36, %v1466_v37  ;;  %v245_v38 = vld [vmem:[%s2769_s15 + $0x10] sm:$0xff] }
  0x58   : > { %v1650_v48 = vmul.f32 %v2787_v22, %v3005_v53  ;;  %v1651_v52 = vmul.f32 %v2787_v22, %v3015_v57  ;;  %v1769_v56 = vrot.slane %v1649_v41, 1  ;;  %v1890_v60 = vmul.f32 %v2857_v7, %v3001_v51 }
  0x59   : > { %v1539_v61 = vadd.f32 %v1465_v45, %v1298_v43  ;;  %v1540_v62 = vadd.f32 %v1467_v35, %v1299_v44  ;;  %v1891_v63 = vmul.f32 %v2857_v7, %v3005_v53  ;;  %v1892_v0 = vmul.f32 %v2857_v7, %v3015_v57  ;;  %v246_v43 = vld [vmem:[%s2769_s15 + $0x18] sm:$0xff] }
  0x5a   : > { %v1770_v59 = vrot.slane %v1650_v48, 1  ;;  %v1772_v2 = vrot.slane %v1651_v52, 1  ;;  %v2010_v16 = vrot.slane %v1890_v60, 2  ;;  %v285_v17 = vmul.f32 0.0, %v243_v42 }
  0x5b   : > { %v1604_v33 = vadd.f32 %v1572_v32, %v1539_v61  ;;  %v1605_v34 = vadd.f32 %v1573_v40, %v1540_v62  ;;  %v2011_v36 = vrot.slane %v1891_v63, 2  ;;  %v2013_v37 = vrot.slane %v1892_v0, 2 }
  0x5c   : > { %v1771_v39 = vsel %vm613_vm2, %v1769_v56, %v1770_v59  ;;  %v1773_v41 = vsel %vm613_vm2, %v1770_v59, %v1772_v2  ;;  %v286_v44 = vmul.f32 0.0, %v244_v58  ;;  %v337_v45 = vrot.slane %v285_v17, 7 }
  0x5d   : > { %v1845_v35 = vadd.f32 %v1771_v39, %v1604_v33  ;;  %v1846_v26 = vadd.f32 %v1773_v41, %v1605_v34  ;;  %v2012_v23 = vsel %vm855_vm3, %v2010_v16, %v2011_v36  ;;  %v2014_v48 = vsel %vm855_vm3, %v2011_v36, %v2013_v37 }
  0x5e   : > { %v338_v52 = vrot.slane %v286_v44, 7  ;;  %v340_v60 = vrot.slane %v243_v42, 7  ;;  %v341_v32 = vrot.slane %v244_v58, 7  ;;  %v343_v40 = vrot.slane %v245_v38, 7 }
  0x5f   : > { %v2086_v61 = vadd.f32 %v2012_v23, %v1845_v35  ;;  %v2087_v62 = vadd.f32 %v2014_v48, %v1846_v26  ;;  %v344_v63 = vrot.slane %v246_v43, 7  ;;  %v445_v56 = vsel %vm336_vm1, 0.0, %v337_v45 }
  0x60   : > { %v339_v0 = vsel %vm336_vm1, %v337_v45, %v338_v52  ;;  %v3085_v59 = vsel %vm336_vm1, %v340_v60, %v341_v32  ;;  %v3088_v2 = vsel %vm336_vm1, 0.0, %v340_v60  ;;  %v3091_v16 = vsel %vm336_vm1, 0.0, %v343_v40 }
  0x61   : > { %v2122_v42 = vadd.f32 %v2890_v1, %v2086_v61  ;;  %v2123_v58 = vadd.f32 %v2890_v1, %v2087_v62  ;;  %v3096_v23 = vsel %vm336_vm1, %v343_v40, %v344_v63  ;;  %v463_v26 = vsel %vm336_vm1, %v338_v52, 0.0 }
  0x62   : > { %v3100_v17 = vsel %vm336_vm1, %v341_v32, 0.0  ;;  %v3103_v33 = vsel %vm336_vm1, %v344_v63, 0.0  ;;  %v484_v34 = vmul.f32 %v2762_v3, %v445_v56  ;;  %v485_v36 = vmul.f32 %v2762_v3, %v339_v0 }
  0x63   : > { %v2154_v37 = vmax.f32 %v2122_v42, 0.0  ;;  %v2155_v38 = vmax.f32 %v2123_v58, 0.0  ;;  %v517_v39 = vmul.f32 %v2764_v4, %v445_v56  ;;  %v518_v41 = vmul.f32 %v2764_v4, %v339_v0 }
  0x64   : > { %v519_v43 = vmul.f32 %v2764_v4, %v463_v26  ;;  %v759_v44 = vmul.f32 %v2771_v5, %v445_v56  ;;  %v760_v45 = vmul.f32 %v2771_v5, %v339_v0  ;;  %v761_v35 = vmul.f32 %v2771_v5, %v463_v26 }
  0x65   : > { %v2174_v48 = vpack.c.bf16 %v2155_v38, %v2154_v37  ;;  %v614_v52 = vrot.slane %v517_v39, 1  ;;  %v615_v60 = vrot.slane %v518_v41, 1  ;;  %v1001_v32 = vmul.f32 %v2773_v6, %v3088_v2 }
  0x66   : > { %v617_v40 = vrot.slane %v519_v43, 1  ;;  %v856_v61 = vrot.slane %v759_v44, 2  ;;  %v857_v62 = vrot.slane %v760_v45, 2  ;;  %v859_v63 = vrot.slane %v761_v35, 2 }
  0x67   : > { %2509 = vmatmul.msk.bf16.vlgmr.msra.gmra.mxu3 %vm2183_vm4, %v2174_v48  ;;  %v616_v42 = vsel %vm613_vm2, %v614_v52, %v615_v60  ;;  %v1002_v56 = vmul.f32 %v2773_v6, %v3085_v59  ;;  %v1066_v0 = vmul.f32 %v2778_v10, %v3088_v2  ;;  %v1067_v58 = vmul.f32 %v2778_v10, %v3085_v59 }
  0x68   : > { %v618_v26 = vsel %vm613_vm2, %v615_v60, %v617_v40  ;;  %v726_v37 = vadd.f32 %v616_v42, %v484_v34  ;;  %v858_v38 = vsel %vm855_vm3, %v856_v61, %v857_v62  ;;  %v860_v39 = vsel %vm855_vm3, %v857_v62, %v859_v63 }
  0x69   : > { %v727_v41 = vadd.f32 %v618_v26, %v485_v36  ;;  %v1068_v43 = vmul.f32 %v2778_v10, %v3100_v17  ;;  %v1162_v44 = vrot.slane %v1066_v0, 1  ;;  %v1163_v45 = vrot.slane %v1067_v58, 1 }
  0x6a   : > { %v968_v35 = vadd.f32 %v858_v38, %v726_v37  ;;  %v1307_v48 = vmul.f32 %v2780_v11, %v3088_v2  ;;  %v1308_v52 = vmul.f32 %v2780_v11, %v3085_v59  ;;  %v1309_v34 = vmul.f32 %v2780_v11, %v3100_v17 }
  0x6b   : > { %v969_v60 = vadd.f32 %v860_v39, %v727_v41  ;;  %v1164_v40 = vsel %vm613_vm2, %v1162_v44, %v1163_v45  ;;  %v1165_v36 = vrot.slane %v1068_v43, 1  ;;  %v1548_v61 = vmul.f32 %v2782_v12, %v3091_v16  ;;  %v255_v44 = vld [vmem:[%s2769_s15 + $0x60] sm:$0xff] }
  0x6c   : > { %v1033_v62 = vadd.f32 %v1001_v32, %v968_v35  ;;  %v1403_v63 = vrot.slane %v1307_v48, 2  ;;  %v1404_v42 = vrot.slane %v1308_v52, 2  ;;  %v1406_v0 = vrot.slane %v1309_v34, 2 }
  0x6d   : > { %v1034_v58 = vadd.f32 %v1002_v56, %v969_v60  ;;  %v1166_v26 = vsel %vm613_vm2, %v1163_v45, %v1165_v36  ;;  %v1549_v37 = vmul.f32 %v2782_v12, %v3096_v23  ;;  %v1613_v38 = vmul.f32 %v2787_v22, %v3091_v16  ;;  %v256_v36 = vld [vmem:[%s2769_s15 + $0x68] sm:$0xff] }
  0x6e   : > { %v1274_v39 = vadd.f32 %v1164_v40, %v1033_v62  ;;  %v1405_v41 = vsel %vm855_vm3, %v1403_v63, %v1404_v42  ;;  %v1407_v43 = vsel %vm855_vm3, %v1404_v42, %v1406_v0  ;;  %v1614_v32 = vmul.f32 %v2787_v22, %v3096_v23 }
  0x6f   : > { %v1275_v35 = vadd.f32 %v1166_v26, %v1034_v58  ;;  %v1615_v56 = vmul.f32 %v2787_v22, %v3103_v33  ;;  %v1709_v45 = vrot.slane %v1613_v38, 1  ;;  %v1854_v48 = vmul.f32 %v2857_v7, %v3091_v16 }
  0x70   : > { %v1515_v52 = vadd.f32 %v1405_v41, %v1274_v39  ;;  %v1710_v34 = vrot.slane %v1614_v32, 1  ;;  %v1855_v60 = vmul.f32 %v2857_v7, %v3096_v23  ;;  %v1856_v40 = vmul.f32 %v2857_v7, %v3103_v33 }
  0x71   : > { %v1516_v62 = vadd.f32 %v1407_v43, %v1275_v35  ;;  %v1712_v63 = vrot.slane %v1615_v56, 1  ;;  %v1950_v42 = vrot.slane %v1854_v48, 2  ;;  %v358_v0 = vrot.slane %v255_v44, 7 }
  0x72   : > { %v1580_v58 = vadd.f32 %v1548_v61, %v1515_v52  ;;  %v1711_v26 = vsel %vm613_vm2, %v1709_v45, %v1710_v34  ;;  %v1951_v38 = vrot.slane %v1855_v60, 2  ;;  %v1953_v24 = vrot.slane %v1856_v40, 2 }
  0x73   : > { %v1581_v54 = vadd.f32 %v1549_v37, %v1516_v62  ;;  %v1713_v39 = vsel %vm613_vm2, %v1710_v34, %v1712_v63  ;;  %v359_v41 = vrot.slane %v256_v36, 7  ;;  %v3159_v32 = vsel %vm336_vm1, 0.0, %v358_v0 }
  0x74   : > { %v1821_v46 = vadd.f32 %v1711_v26, %v1580_v58  ;;  %v1952_v47 = vsel %vm855_vm3, %v1950_v42, %v1951_v38  ;;  %v1954_v43 = vsel %vm855_vm3, %v1951_v38, %v1953_v24  ;;  %v494_v44 = vmul.f32 %v2762_v3, %v2796_v25 }
  0x75   : > { %v1822_v61 = vadd.f32 %v1713_v39, %v1581_v54  ;;  %v3166_v35 = vsel %vm336_vm1, %v358_v0, %v359_v41  ;;  %v3169_v37 = vsel %vm336_vm1, %v359_v41, 0.0  ;;  %v495_v56 = vmul.f32 %v2762_v3, %v2802_v27 }
  0x76   : > { %v2062_v45 = vadd.f32 %v1952_v47, %v1821_v46  ;;  %v532_v48 = vmul.f32 %v2764_v4, %v2796_v25  ;;  %v533_v24 = vmul.f32 %v2764_v4, %v2802_v27  ;;  %v534_v52 = vmul.f32 %v2764_v4, %v2811_v30 }
  0x77   : > { %v2063_v54 = vadd.f32 %v1954_v43, %v1822_v61  ;;  %v774_v34 = vmul.f32 %v2771_v5, %v2796_v25  ;;  %v775_v60 = vmul.f32 %v2771_v5, %v2802_v27  ;;  %v776_v40 = vmul.f32 %v2771_v5, %v2811_v30 }
  0x78   : > { %v2098_v46 = vadd.f32 %v2890_v1, %v2062_v45  ;;  %v639_v47 = vrot.slane %v532_v48, 1  ;;  %v640_v36 = vrot.slane %v533_v24, 1  ;;  %v642_v62 = vrot.slane %v534_v52, 1 }
  0x79   : > { %v2099_v63 = vadd.f32 %v2890_v1, %v2063_v54  ;;  %v881_v42 = vrot.slane %v774_v34, 2  ;;  %v882_v0 = vrot.slane %v775_v60, 2  ;;  %v884_v58 = vrot.slane %v776_v40, 2 }
  0x7a   : > { %v2130_v26 = vmax.f32 %v2098_v46, 0.0  ;;  %v641_v38 = vsel %vm613_vm2, %v639_v47, %v640_v36  ;;  %v643_v39 = vsel %vm613_vm2, %v640_v36, %v642_v62  ;;  %v1011_v41 = vmul.f32 %v2773_v6, %v2808_v29 }
  0x7b   : > { %v2131_v43 = vmax.f32 %v2099_v63, 0.0  ;;  %v736_v61 = vadd.f32 %v641_v38, %v494_v44  ;;  %v737_v30 = vadd.f32 %v643_v39, %v495_v56  ;;  %v883_v45 = vsel %vm855_vm3, %v881_v42, %v882_v0 }
  0x7c   : > { %v885_v48 = vsel %vm855_vm3, %v882_v0, %v884_v58  ;;  %v1012_v24 = vmul.f32 %v2773_v6, %v2805_v28  ;;  %v1081_v52 = vmul.f32 %v2778_v10, %v2808_v29  ;;  %v1082_v54 = vmul.f32 %v2778_v10, %v2805_v28 }
  0x7d   : > { %v2162_v34 = vpack.c.bf16 %v2131_v43, %v2130_v26  ;;  %v978_v60 = vadd.f32 %v883_v45, %v736_v61  ;;  %v979_v40 = vadd.f32 %v885_v48, %v737_v30  ;;  %v1083_v44 = vmul.f32 %v2778_v10, %v2814_v31 }
  0x7e   : > { %v1187_v56 = vrot.slane %v1081_v52, 1  ;;  %v1188_v46 = vrot.slane %v1082_v54, 1  ;;  %v1322_v47 = vmul.f32 %v2780_v11, %v2808_v29  ;;  %v1323_v36 = vmul.f32 %v2780_v11, %v2805_v28 }
  0x7f   : > { %2497 = vmatmul.msk.bf16.vlgmr.msra.gmra.mxu0 %vm2183_vm4, %v2162_v34  ;;  %v1043_v62 = vadd.f32 %v1011_v41, %v978_v60  ;;  %v1044_v63 = vadd.f32 %v1012_v24, %v979_v40  ;;  %v1190_v42 = vrot.slane %v1083_v44, 1  ;;  %v1324_v0 = vmul.f32 %v2780_v11, %v2814_v31  ;;  %v263_v44 = vld [vmem:[%s2769_s15 + $0xa0] sm:$0xff] }
  0x80   : > { %v1189_v30 = vsel %vm613_vm2, %v1187_v56, %v1188_v46  ;;  %v1428_v58 = vrot.slane %v1322_v47, 2  ;;  %v1429_v26 = vrot.slane %v1323_v36, 2  ;;  %v1558_v38 = vmul.f32 %v2782_v12, %v3159_v32 }
  0x81   : > { %v1191_v39 = vsel %vm613_vm2, %v1188_v46, %v1190_v42  ;;  %v1284_v43 = vadd.f32 %v1189_v30, %v1043_v62  ;;  %v1431_v61 = vrot.slane %v1324_v0, 2  ;;  %v1559_v41 = vmul.f32 %v2782_v12, %v3166_v35  ;;  %v264_v62 = vld [vmem:[%s2769_s15 + $0xa8] sm:$0xff] }
  0x82   : > { %v1285_v45 = vadd.f32 %v1191_v39, %v1044_v63  ;;  %v1430_v48 = vsel %vm855_vm3, %v1428_v58, %v1429_v26  ;;  %v1628_v24 = vmul.f32 %v2787_v22, %v3159_v32  ;;  %v1629_v52 = vmul.f32 %v2787_v22, %v3166_v35 }
  0x83   : > { %v1432_v54 = vsel %vm855_vm3, %v1429_v26, %v1431_v61  ;;  %v1525_v34 = vadd.f32 %v1430_v48, %v1284_v43  ;;  %v1630_v60 = vmul.f32 %v2787_v22, %v3169_v37  ;;  %v1869_v40 = vmul.f32 %v2857_v7, %v3159_v32 }
  0x84   : > { %v1526_v56 = vadd.f32 %v1432_v54, %v1285_v45  ;;  %v1734_v46 = vrot.slane %v1628_v24, 1  ;;  %v1735_v47 = vrot.slane %v1629_v52, 1  ;;  %v1870_v36 = vmul.f32 %v2857_v7, %v3166_v35 }
  0x85   : > { %v1590_v63 = vadd.f32 %v1558_v38, %v1525_v34  ;;  %v1737_v42 = vrot.slane %v1630_v60, 1  ;;  %v1871_v0 = vmul.f32 %v2857_v7, %v3169_v37  ;;  %v1975_v30 = vrot.slane %v1869_v40, 2 }
  0x86   : > { %v1591_v58 = vadd.f32 %v1559_v41, %v1526_v56  ;;  %v1736_v26 = vsel %vm613_vm2, %v1734_v46, %v1735_v47  ;;  %v1976_v39 = vrot.slane %v1870_v36, 2  ;;  %v370_v43 = vrot.slane %v263_v44, 7 }
  0x87   : > { %v1738_v61 = vsel %vm613_vm2, %v1735_v47, %v1737_v42  ;;  %v1831_v45 = vadd.f32 %v1736_v26, %v1590_v63  ;;  %v1978_v48 = vrot.slane %v1871_v0, 2  ;;  %v371_v24 = vrot.slane %v264_v62, 7 }
  0x88   : > { %v1832_v52 = vadd.f32 %v1738_v61, %v1591_v58  ;;  %v1977_v54 = vsel %vm855_vm3, %v1975_v30, %v1976_v39  ;;  %v3234_v38 = vsel %vm336_vm1, 0.0, %v370_v43  ;;  %v502_v34 = vmul.f32 %v2762_v3, %v2902_v14 }
  0x89   : > { %v1979_v41 = vsel %vm855_vm3, %v1976_v39, %v1978_v48  ;;  %v2072_v60 = vadd.f32 %v1977_v54, %v1831_v45  ;;  %v3240_v40 = vsel %vm336_vm1, %v370_v43, %v371_v24  ;;  %v3243_v44 = vsel %vm336_vm1, %v371_v24, 0.0 }
  0x8a   : > { %v2073_v56 = vadd.f32 %v1979_v41, %v1832_v52  ;;  %v503_v46 = vmul.f32 %v2762_v3, %v2896_v9  ;;  %v544_v47 = vmul.f32 %v2764_v4, %v2902_v14  ;;  %v545_v36 = vmul.f32 %v2764_v4, %v2896_v9 }
  0x8b   : > { %v2108_v62 = vadd.f32 %v2890_v1, %v2072_v60  ;;  %v546_v63 = vmul.f32 %v2764_v4, %v2914_v20  ;;  %v786_v42 = vmul.f32 %v2771_v5, %v2902_v14  ;;  %v787_v0 = vmul.f32 %v2771_v5, %v2896_v9 }
  0x8c   : > { %v2109_v30 = vadd.f32 %v2890_v1, %v2073_v56  ;;  %v659_v58 = vrot.slane %v544_v47, 1  ;;  %v660_v26 = vrot.slane %v545_v36, 1  ;;  %v788_v39 = vmul.f32 %v2771_v5, %v2914_v20 }
  0x8d   : > { %v2140_v43 = vmax.f32 %v2108_v62, 0.0  ;;  %v662_v61 = vrot.slane %v546_v63, 1  ;;  %v901_v45 = vrot.slane %v786_v42, 2  ;;  %v902_v48 = vrot.slane %v787_v0, 2 }
  0x8e   : > { %v2141_v24 = vmax.f32 %v2109_v30, 0.0  ;;  %v661_v52 = vsel %vm613_vm2, %v659_v58, %v660_v26  ;;  %v904_v54 = vrot.slane %v788_v39, 2  ;;  %v1019_v41 = vmul.f32 %v2773_v6, %v2905_v15 }
  0x8f   : > { %v663_v60 = vsel %vm613_vm2, %v660_v26, %v662_v61  ;;  %v744_v27 = vadd.f32 %v661_v52, %v502_v34  ;;  %v903_v56 = vsel %vm855_vm3, %v901_v45, %v902_v48  ;;  %v1020_v47 = vmul.f32 %v2773_v6, %v2908_v18 }
  0x90   : > { %v2167_v36 = vpack.c.bf16 %v2141_v24, %v2140_v43  ;;  %v745_v62 = vadd.f32 %v663_v60, %v503_v46  ;;  %v905_v63 = vsel %vm855_vm3, %v902_v48, %v904_v54  ;;  %v1093_v42 = vmul.f32 %v2778_v10, %v2905_v15 }
  0x91   : > { %v986_v0 = vadd.f32 %v903_v56, %v744_v27  ;;  %v1094_v30 = vmul.f32 %v2778_v10, %v2908_v18  ;;  %v1095_v58 = vmul.f32 %v2778_v10, %v2917_v21  ;;  %v1334_v34 = vmul.f32 %v2780_v11, %v2905_v15 }
  0x92   : > { %2502 = vmatmul.msk.bf16.gmra.mxu1 %vm2183_vm4, %v2167_v36  ;;  %v987_v26 = vadd.f32 %v905_v63, %v745_v62  ;;  %v1207_v39 = vrot.slane %v1093_v42, 1  ;;  %v1335_v46 = vmul.f32 %v2780_v11, %v2908_v18  ;;  %v1336_v43 = vmul.f32 %v2780_v11, %v2917_v21 }
  0x93   : > { %v1051_v27 = vadd.f32 %v1019_v41, %v986_v0  ;;  %v1208_v61 = vrot.slane %v1094_v30, 1  ;;  %v1210_v45 = vrot.slane %v1095_v58, 1  ;;  %v1448_v48 = vrot.slane %v1334_v34, 2  ;;  %v271_v30 = vld [vmem:[%s2769_s15 + $0xe0] sm:$0xff] }
  0x94   : > { %v1052_v24 = vadd.f32 %v1020_v47, %v987_v26  ;;  %v1449_v52 = vrot.slane %v1335_v46, 2  ;;  %v1451_v54 = vrot.slane %v1336_v43, 2  ;;  %v1566_v60 = vmul.f32 %v2782_v12, %v3234_v38 }
  0x95   : > { %v1209_v56 = vsel %vm613_vm2, %v1207_v39, %v1208_v61  ;;  %v1211_v36 = vsel %vm613_vm2, %v1208_v61, %v1210_v45  ;;  %v1567_v62 = vmul.f32 %v2782_v12, %v3240_v40  ;;  %v1640_v41 = vmul.f32 %v2787_v22, %v3234_v38  ;;  %v272_v45 = vld [vmem:[%s2769_s15 + $0xe8] sm:$0xff] }
  0x96   : > { %v1292_v63 = vadd.f32 %v1209_v56, %v1051_v27  ;;  %v1293_v42 = vadd.f32 %v1211_v36, %v1052_v24  ;;  %v1450_v47 = vsel %vm855_vm3, %v1448_v48, %v1449_v52  ;;  %v1452_v0 = vsel %vm855_vm3, %v1449_v52, %v1451_v54 }
  0x97   : > { %v1641_v58 = vmul.f32 %v2787_v22, %v3240_v40  ;;  %v1642_v34 = vmul.f32 %v2787_v22, %v3243_v44  ;;  %v1754_v26 = vrot.slane %v1640_v41, 1  ;;  %v1881_v39 = vmul.f32 %v2857_v7, %v3234_v38 }
  0x98   : > { %v1533_v46 = vadd.f32 %v1450_v47, %v1292_v63  ;;  %v1534_v43 = vadd.f32 %v1452_v0, %v1293_v42  ;;  %v1882_v27 = vmul.f32 %v2857_v7, %v3240_v40  ;;  %v1883_v61 = vmul.f32 %v2857_v7, %v3243_v44 }
  0x99   : > { %v1755_v48 = vrot.slane %v1641_v58, 1  ;;  %v1757_v24 = vrot.slane %v1642_v34, 1  ;;  %v1995_v52 = vrot.slane %v1881_v39, 2  ;;  %v382_v54 = vrot.slane %v271_v30, 7 }
  0x9a   : > { %v1598_v56 = vadd.f32 %v1566_v60, %v1533_v46  ;;  %v1599_v36 = vadd.f32 %v1567_v62, %v1534_v43  ;;  %v1996_v25 = vrot.slane %v1882_v27, 2  ;;  %v1998_v41 = vrot.slane %v1883_v61, 2 }
  0x9b   : > { %v1756_v20 = vsel %vm613_vm2, %v1754_v26, %v1755_v48  ;;  %v1758_v63 = vsel %vm613_vm2, %v1755_v48, %v1757_v24  ;;  %v383_v42 = vrot.slane %v272_v45, 7  ;;  %v3307_v47 = vsel %vm336_vm1, 0.0, %v382_v54 }
  0x9c   : > { %v1839_v0 = vadd.f32 %v1756_v20, %v1598_v56  ;;  %v1840_v9 = vadd.f32 %v1758_v63, %v1599_v36  ;;  %v1997_v7 = vsel %vm855_vm3, %v1995_v52, %v1996_v25  ;;  %v1999_v58 = vsel %vm855_vm3, %v1996_v25, %v1998_v41 }
  0x9d   : > { %v3312_v30 = vsel %vm336_vm1, %v382_v54, %v383_v42  ;;  %v3315_v60 = vsel %vm336_vm1, %v383_v42, 0.0  ;;  %v510_v62 = vmul.f32 %v2762_v3, %v2998_v50  ;;  %v511_v34 = vmul.f32 %v2762_v3, %v2995_v49 }
  0x9e   : > { %v2080_v26 = vadd.f32 %v1997_v7, %v1839_v0  ;;  %v2081_v39 = vadd.f32 %v1999_v58, %v1840_v9  ;;  %v556_v20 = vmul.f32 %v2764_v4, %v2998_v50  ;;  %v557_v25 = vmul.f32 %v2764_v4, %v2995_v49 }
  0x9f   : > { %v558_v46 = vmul.f32 %v2764_v4, %v3011_v55  ;;  %v798_v43 = vmul.f32 %v2771_v5, %v2998_v50  ;;  %v799_v27 = vmul.f32 %v2771_v5, %v2995_v49  ;;  %v800_v61 = vmul.f32 %v2771_v5, %v3011_v55 }
  0xa0   : > { %v2116_v9 = vadd.f32 %v2890_v1, %v2080_v26  ;;  %v2117_v45 = vadd.f32 %v2890_v1, %v2081_v39  ;;  %v679_v48 = vrot.slane %v556_v20, 1  ;;  %v680_v24 = vrot.slane %v557_v25, 1 }
  0xa1   : > { %v682_v52 = vrot.slane %v558_v46, 1  ;;  %v921_v54 = vrot.slane %v798_v43, 2  ;;  %v922_v56 = vrot.slane %v799_v27, 2  ;;  %v924_v36 = vrot.slane %v800_v61, 2 }
  0xa2   : > { %v2148_v41 = vmax.f32 %v2116_v9, 0.0  ;;  %v2149_v63 = vmax.f32 %v2117_v45, 0.0  ;;  %v681_v42 = vsel %vm613_vm2, %v679_v48, %v680_v24  ;;  %v1027_v0 = vmul.f32 %v2773_v6, %v3001_v51 }
  0xa3   : > { %v683_v7 = vsel %vm613_vm2, %v680_v24, %v682_v52  ;;  %v752_v58 = vadd.f32 %v681_v42, %v510_v62  ;;  %v923_v26 = vsel %vm855_vm3, %v921_v54, %v922_v56  ;;  %v925_v1 = vsel %vm855_vm3, %v922_v56, %v924_v36 }
  0xa4   : > { %v2171_v39 = vpack.c.bf16 %v2149_v63, %v2148_v41  ;;  %v753_v20 = vadd.f32 %v683_v7, %v511_v34  ;;  %v1028_v25 = vmul.f32 %v2773_v6, %v3005_v53  ;;  %v1105_v46 = vmul.f32 %v2778_v10, %v3001_v51 }
  0xa5   : > { %v994_v43 = vadd.f32 %v923_v26, %v752_v58  ;;  %v1106_v27 = vmul.f32 %v2778_v10, %v3005_v53  ;;  %v1107_v61 = vmul.f32 %v2778_v10, %v3015_v57  ;;  %v1346_v62 = vmul.f32 %v2780_v11, %v3001_v51 }
  0xa6   : > { %2506 = vmatmul.msk.bf16.gmra.mxu2 %vm2183_vm4, %v2171_v39  ;;  %v995_v9 = vadd.f32 %v925_v1, %v753_v20  ;;  %v1227_v34 = vrot.slane %v1105_v46, 1  ;;  %v1347_v45 = vmul.f32 %v2780_v11, %v3005_v53  ;;  %v1348_v48 = vmul.f32 %v2780_v11, %v3015_v57  ;;  %v247_v46 = vld [vmem:[%s2769_s15 + $0x20] sm:$0xff] }
  0xa7   : > { %v1059_v24 = vadd.f32 %v1027_v0, %v994_v43  ;;  %v1228_v52 = vrot.slane %v1106_v27, 1  ;;  %v1230_v54 = vrot.slane %v1107_v61, 1  ;;  %v1468_v56 = vrot.slane %v1346_v62, 2  ;;  %v3374_v62 = vld [vmem:[%s4133_s1 + $0x8] ss:$0 sm:$0xff] }
  0xa8   : > { %v1060_v36 = vadd.f32 %v1028_v25, %v995_v9  ;;  %v1469_v41 = vrot.slane %v1347_v45, 2  ;;  %v1471_v63 = vrot.slane %v1348_v48, 2  ;;  %v1574_v42 = vmul.f32 %v2782_v12, %v3307_v47 }
  0xa9   : > { %v1229_v7 = vsel %vm613_vm2, %v1227_v34, %v1228_v52  ;;  %v1231_v58 = vsel %vm613_vm2, %v1228_v52, %v1230_v54  ;;  %v1575_v26 = vmul.f32 %v2782_v12, %v3312_v30  ;;  %v1652_v0 = vmul.f32 %v2787_v22, %v3307_v47  ;;  %v248_v52 = vld [vmem:[%s2769_s15 + $0x28] sm:$0xff] }
  0xaa   : > { %v1300_v1 = vadd.f32 %v1229_v7, %v1059_v24  ;;  %v1301_v39 = vadd.f32 %v1231_v58, %v1060_v36  ;;  %v1470_v20 = vsel %vm855_vm3, %v1468_v56, %v1469_v41  ;;  %v1472_v25 = vsel %vm855_vm3, %v1469_v41, %v1471_v63 }
  0xab   : > { %v1653_v43 = vmul.f32 %v2787_v22, %v3312_v30  ;;  %v1654_v27 = vmul.f32 %v2787_v22, %v3315_v60  ;;  %v1774_v61 = vrot.slane %v1652_v0, 1  ;;  %v1893_v9 = vmul.f32 %v3374_v62, %v3307_v47 }
  0xac   : > { %v1541_v34 = vadd.f32 %v1470_v20, %v1300_v1  ;;  %v1542_v45 = vadd.f32 %v1472_v25, %v1301_v39  ;;  %v1894_v48 = vmul.f32 %v3374_v62, %v3312_v30  ;;  %v1895_v24 = vmul.f32 %v3374_v62, %v3315_v60 }
  0xad   : > { %v1775_v54 = vrot.slane %v1653_v43, 1  ;;  %v1777_v56 = vrot.slane %v1654_v27, 1  ;;  %v2015_v36 = vrot.slane %v1893_v9, 2  ;;  %v346_v41 = vrot.slane %v247_v46, 7 }
  0xae   : > { %v1606_v63 = vadd.f32 %v1574_v42, %v1541_v34  ;;  %v1607_v7 = vadd.f32 %v1575_v26, %v1542_v45  ;;  %v2016_v58 = vrot.slane %v1894_v48, 2  ;;  %v2018_v0 = vrot.slane %v1895_v24, 2 }
  0xaf   : > { %v1776_v55 = vsel %vm613_vm2, %v1774_v61, %v1775_v54  ;;  %v1778_v1 = vsel %vm613_vm2, %v1775_v54, %v1777_v56  ;;  %v347_v39 = vrot.slane %v248_v52, 7  ;;  %v3386_v20 = vsel %vm336_vm1, 0.0, %v346_v41 }
  0xb0   : > { %v1847_v25 = vadd.f32 %v1776_v55, %v1606_v63  ;;  %v1848_v49 = vadd.f32 %v1778_v1, %v1607_v7  ;;  %v2017_v50 = vsel %vm855_vm3, %v2015_v36, %v2016_v58  ;;  %v2019_v43 = vsel %vm855_vm3, %v2016_v58, %v2018_v0 }
  0xb1   : > { %v3391_v46 = vsel %vm336_vm1, %v346_v41, %v347_v39  ;;  %v3394_v42 = vsel %vm336_vm1, %v347_v39, 0.0  ;;  %v486_v26 = vmul.f32 %v2762_v3, %v3088_v2  ;;  %v487_v27 = vmul.f32 %v2762_v3, %v3085_v59 }
  0xb2   : > { %v2088_v61 = vadd.f32 %v2017_v50, %v1847_v25  ;;  %v2089_v9 = vadd.f32 %v2019_v43, %v1848_v49  ;;  %v520_v55 = vmul.f32 %v2764_v4, %v3088_v2  ;;  %v521_v34 = vmul.f32 %v2764_v4, %v3085_v59  ;;  %v3415_v49 = vld [vmem:[%s4134_s2] ss:$0 sm:$0xff] }
  0xb3   : > { %v522_v45 = vmul.f32 %v2764_v4, %v3100_v17  ;;  %v762_v48 = vmul.f32 %v2771_v5, %v3088_v2  ;;  %v763_v24 = vmul.f32 %v2771_v5, %v3085_v59  ;;  %v764_v52 = vmul.f32 %v2771_v5, %v3100_v17 }
  0xb4   : > { %v2124_v50 = vadd.f32 %v3415_v49, %v2088_v61  ;;  %v2125_v54 = vadd.f32 %v3415_v49, %v2089_v9  ;;  %v619_v56 = vrot.slane %v520_v55, 1  ;;  %v620_v36 = vrot.slane %v521_v34, 1 }
  0xb5   : > { %v622_v41 = vrot.slane %v522_v45, 1  ;;  %v861_v63 = vrot.slane %v762_v48, 2  ;;  %v862_v2 = vrot.slane %v763_v24, 2  ;;  %v864_v7 = vrot.slane %v764_v52, 2 }
  0xb6   : > { %v2156_v58 = vmax.f32 %v2124_v50, 0.0  ;;  %v2157_v59 = vmax.f32 %v2125_v54, 0.0  ;;  %v621_v0 = vsel %vm613_vm2, %v619_v56, %v620_v36  ;;  %v1003_v17 = vmul.f32 %v2773_v6, %v3091_v16 }
  0xb7   : > { %v623_v1 = vsel %vm613_vm2, %v620_v36, %v622_v41  ;;  %v728_v39 = vadd.f32 %v621_v0, %v486_v26  ;;  %v863_v25 = vsel %vm855_vm3, %v861_v63, %v862_v2  ;;  %v865_v43 = vsel %vm855_vm3, %v862_v2, %v864_v7 }
  0xb8   : > { %v2175_v61 = vpack.c.bf16 %v2157_v59, %v2156_v58  ;;  %v729_v9 = vadd.f32 %v623_v1, %v487_v27  ;;  %v1004_v55 = vmul.f32 %v2773_v6, %v3096_v23  ;;  %v1069_v34 = vmul.f32 %v2778_v10, %v3091_v16 }
  0xb9   : > { %v970_v45 = vadd.f32 %v863_v25, %v728_v39  ;;  %v1070_v48 = vmul.f32 %v2778_v10, %v3096_v23  ;;  %v1071_v24 = vmul.f32 %v2778_v10, %v3103_v33  ;;  %v1310_v26 = vmul.f32 %v2780_v11, %v3091_v16 }
  0xba   : > { %2510 = vmatmul.msk.bf16.gmra.mxu3 %vm2183_vm4, %v2175_v61  ;;  %v971_v52 = vadd.f32 %v865_v43, %v729_v9  ;;  %v1167_v27 = vrot.slane %v1069_v34, 1  ;;  %v1311_v50 = vmul.f32 %v2780_v11, %v3096_v23  ;;  %v1312_v54 = vmul.f32 %v2780_v11, %v3103_v33 }
  0xbb   : > { %v1035_v56 = vadd.f32 %v1003_v17, %v970_v45  ;;  %v1168_v36 = vrot.slane %v1070_v48, 1  ;;  %v1170_v41 = vrot.slane %v1071_v24, 1  ;;  %v1408_v63 = vrot.slane %v1310_v26, 2 }
  0xbc   : > { %v1036_v2 = vadd.f32 %v1004_v55, %v971_v52  ;;  %v1409_v7 = vrot.slane %v1311_v50, 2  ;;  %v1411_v58 = vrot.slane %v1312_v54, 2  ;;  %v1550_v59 = vmul.f32 %v2782_v12, %v3386_v20 }
  0xbd   : > { %v1169_v0 = vsel %vm613_vm2, %v1167_v27, %v1168_v36  ;;  %v1171_v1 = vsel %vm613_vm2, %v1168_v36, %v1170_v41  ;;  %v1551_v39 = vmul.f32 %v2782_v12, %v3391_v46  ;;  %v1616_v25 = vmul.f32 %v2787_v22, %v3386_v20 }
  0xbe   : > { %v1276_v17 = vadd.f32 %v1169_v0, %v1035_v56  ;;  %v1277_v43 = vadd.f32 %v1171_v1, %v1036_v2  ;;  %v1410_v61 = vsel %vm855_vm3, %v1408_v63, %v1409_v7  ;;  %v1412_v9 = vsel %vm855_vm3, %v1409_v7, %v1411_v58 }
  0xbf   : > { %v1617_v55 = vmul.f32 %v2787_v22, %v3391_v46  ;;  %v1618_v34 = vmul.f32 %v2787_v22, %v3394_v42  ;;  %v1714_v45 = vrot.slane %v1616_v25, 1  ;;  %v1857_v48 = vmul.f32 %v3374_v62, %v3386_v20 }
  0xc0   : > { %v1517_v24 = vadd.f32 %v1410_v61, %v1276_v17  ;;  %v1518_v26 = vadd.f32 %v1412_v9, %v1277_v43  ;;  %v1858_v52 = vmul.f32 %v3374_v62, %v3391_v46  ;;  %v1859_v27 = vmul.f32 %v3374_v62, %v3394_v42 }
  0xc1   : > { %v1715_v50 = vrot.slane %v1617_v55, 1  ;;  %v1717_v54 = vrot.slane %v1618_v34, 1  ;;  %v1955_v56 = vrot.slane %v1857_v48, 2  ;;  %v496_v36 = vmul.f32 %v2762_v3, %v2808_v29 }
  0xc2   : > { %v1582_v41 = vadd.f32 %v1550_v59, %v1517_v24  ;;  %v1583_v63 = vadd.f32 %v1551_v39, %v1518_v26  ;;  %v1956_v2 = vrot.slane %v1858_v52, 2  ;;  %v1958_v7 = vrot.slane %v1859_v27, 2 }
  0xc3   : > { %v1716_v58 = vsel %vm613_vm2, %v1714_v45, %v1715_v50  ;;  %v1718_v0 = vsel %vm613_vm2, %v1715_v50, %v1717_v54  ;;  %v497_v1 = vmul.f32 %v2762_v3, %v2805_v28  ;;  %v535_v25 = vmul.f32 %v2764_v4, %v2808_v29 }
  0xc4   : > { %v1823_v17 = vadd.f32 %v1716_v58, %v1582_v41  ;;  %v1824_v43 = vadd.f32 %v1718_v0, %v1583_v63  ;;  %v1957_v61 = vsel %vm855_vm3, %v1955_v56, %v1956_v2  ;;  %v1959_v9 = vsel %vm855_vm3, %v1956_v2, %v1958_v7 }
  0xc5   : > { %v536_v59 = vmul.f32 %v2764_v4, %v2805_v28  ;;  %v537_v39 = vmul.f32 %v2764_v4, %v2814_v31  ;;  %v644_v55 = vrot.slane %v535_v25, 1  ;;  %v777_v34 = vmul.f32 %v2771_v5, %v2808_v29 }
  0xc6   : > { %v2064_v45 = vadd.f32 %v1957_v61, %v1823_v17  ;;  %v2065_v48 = vadd.f32 %v1959_v9, %v1824_v43  ;;  %v778_v24 = vmul.f32 %v2771_v5, %v2805_v28  ;;  %v779_v26 = vmul.f32 %v2771_v5, %v2814_v31 }
  0xc7   : > { %v645_v52 = vrot.slane %v536_v59, 1  ;;  %v647_v27 = vrot.slane %v537_v39, 1  ;;  %v886_v50 = vrot.slane %v777_v34, 2  ;;  %v1013_v54 = vmul.f32 %v2773_v6, %v3159_v32 }
  0xc8   : > { %v2100_v56 = vadd.f32 %v3415_v49, %v2064_v45  ;;  %v2101_v41 = vadd.f32 %v3415_v49, %v2065_v48  ;;  %v887_v63 = vrot.slane %v778_v24, 2  ;;  %v889_v29 = vrot.slane %v779_v26, 2 }
  0xc9   : > { %v646_v2 = vsel %vm613_vm2, %v644_v55, %v645_v52  ;;  %v648_v7 = vsel %vm613_vm2, %v645_v52, %v647_v27  ;;  %v1014_v28 = vmul.f32 %v2773_v6, %v3166_v35  ;;  %v1084_v31 = vmul.f32 %v2778_v10, %v3159_v32 }
  0xca   : > { %v2132_v58 = vmax.f32 %v2100_v56, 0.0  ;;  %v2133_v0 = vmax.f32 %v2101_v41, 0.0  ;;  %v738_v25 = vadd.f32 %v646_v2, %v496_v36  ;;  %v739_v17 = vadd.f32 %v648_v7, %v497_v1 }
  0xcb   : > { %v888_v43 = vsel %vm855_vm3, %v886_v50, %v887_v63  ;;  %v890_v61 = vsel %vm855_vm3, %v887_v63, %v889_v29  ;;  %v1085_v9 = vmul.f32 %v2778_v10, %v3166_v35  ;;  %v1086_v59 = vmul.f32 %v2778_v10, %v3169_v37 }
  0xcc   : > { %v2163_v39 = vpack.c.bf16 %v2133_v0, %v2132_v58  ;;  %v980_v55 = vadd.f32 %v888_v43, %v738_v25  ;;  %v981_v34 = vadd.f32 %v890_v61, %v739_v17  ;;  %v1192_v45 = vrot.slane %v1084_v31, 1 }
  0xcd   : > { %v1193_v48 = vrot.slane %v1085_v9, 1  ;;  %v1195_v24 = vrot.slane %v1086_v59, 1  ;;  %v1325_v36 = vmul.f32 %v2780_v11, %v3159_v32  ;;  %v1326_v1 = vmul.f32 %v2780_v11, %v3166_v35 }
  0xce   : > { %2498 = vmatmul.msk.bf16.gmra.mxu0 %vm2183_vm4, %v2163_v39  ;;  %v1045_v26 = vadd.f32 %v1013_v54, %v980_v55  ;;  %v1046_v52 = vadd.f32 %v1014_v28, %v981_v34  ;;  %v1327_v27 = vmul.f32 %v2780_v11, %v3169_v37  ;;  %v1560_v50 = vmul.f32 %v2782_v12, %v2899_v13 }
  0xcf   : > { %v1194_v56 = vsel %vm613_vm2, %v1192_v45, %v1193_v48  ;;  %v1196_v41 = vsel %vm613_vm2, %v1193_v48, %v1195_v24  ;;  %v1433_v63 = vrot.slane %v1325_v36, 2  ;;  %v1434_v29 = vrot.slane %v1326_v1, 2 }
  0xd0   : > { %v1286_v2 = vadd.f32 %v1194_v56, %v1045_v26  ;;  %v1287_v7 = vadd.f32 %v1196_v41, %v1046_v52  ;;  %v1436_v31 = vrot.slane %v1327_v27, 2  ;;  %v1561_v58 = vmul.f32 %v2782_v12, %v2893_v8 }
  0xd1   : > { %v1435_v54 = vsel %vm855_vm3, %v1433_v63, %v1434_v29  ;;  %v1631_v28 = vmul.f32 %v2787_v22, %v2899_v13  ;;  %v1632_v0 = vmul.f32 %v2787_v22, %v2893_v8  ;;  %v1633_v25 = vmul.f32 %v2787_v22, %v2911_v19 }
  0xd2   : > { %v1437_v17 = vsel %vm855_vm3, %v1434_v29, %v1436_v31  ;;  %v1527_v43 = vadd.f32 %v1435_v54, %v1286_v2  ;;  %v1872_v61 = vmul.f32 %v3374_v62, %v2899_v13  ;;  %v1873_v9 = vmul.f32 %v3374_v62, %v2893_v8 }
  0xd3   : > { %v1528_v59 = vadd.f32 %v1437_v17, %v1287_v7  ;;  %v1739_v39 = vrot.slane %v1631_v28, 1  ;;  %v1740_v55 = vrot.slane %v1632_v0, 1  ;;  %v1742_v34 = vrot.slane %v1633_v25, 1 }
  0xd4   : > { %v1592_v45 = vadd.f32 %v1560_v50, %v1527_v43  ;;  %v1874_v48 = vmul.f32 %v3374_v62, %v2911_v19  ;;  %v1980_v24 = vrot.slane %v1872_v61, 2  ;;  %v1981_v36 = vrot.slane %v1873_v9, 2 }
  0xd5   : > { %v1593_v1 = vadd.f32 %v1561_v58, %v1528_v59  ;;  %v1741_v26 = vsel %vm613_vm2, %v1739_v39, %v1740_v55  ;;  %v1743_v52 = vsel %vm613_vm2, %v1740_v55, %v1742_v34  ;;  %v504_v27 = vmul.f32 %v2762_v3, %v2905_v15 }
  0xd6   : > { %v1833_v56 = vadd.f32 %v1741_v26, %v1592_v45  ;;  %v1982_v41 = vsel %vm855_vm3, %v1980_v24, %v1981_v36  ;;  %v1983_v63 = vrot.slane %v1874_v48, 2  ;;  %v505_v50 = vmul.f32 %v2762_v3, %v2908_v18 }
  0xd7   : > { %v1834_v29 = vadd.f32 %v1743_v52, %v1593_v1  ;;  %v547_v2 = vmul.f32 %v2764_v4, %v2905_v15  ;;  %v548_v7 = vmul.f32 %v2764_v4, %v2908_v18  ;;  %v549_v31 = vmul.f32 %v2764_v4, %v2917_v21 }
  0xd8   : > { %v1984_v58 = vsel %vm855_vm3, %v1981_v36, %v1983_v63  ;;  %v2074_v54 = vadd.f32 %v1982_v41, %v1833_v56  ;;  %v789_v28 = vmul.f32 %v2771_v5, %v2905_v15  ;;  %v790_v0 = vmul.f32 %v2771_v5, %v2908_v18 }
  0xd9   : > { %v2075_v25 = vadd.f32 %v1984_v58, %v1834_v29  ;;  %v664_v17 = vrot.slane %v547_v2, 1  ;;  %v665_v43 = vrot.slane %v548_v7, 1  ;;  %v667_v61 = vrot.slane %v549_v31, 1 }
  0xda   : > { %v2110_v9 = vadd.f32 %v3415_v49, %v2074_v54  ;;  %v791_v59 = vmul.f32 %v2771_v5, %v2917_v21  ;;  %v906_v39 = vrot.slane %v789_v28, 2  ;;  %v907_v55 = vrot.slane %v790_v0, 2 }
  0xdb   : > { %v2111_v34 = vadd.f32 %v3415_v49, %v2075_v25  ;;  %v666_v45 = vsel %vm613_vm2, %v664_v17, %v665_v43  ;;  %v668_v15 = vsel %vm613_vm2, %v665_v43, %v667_v61  ;;  %v1021_v18 = vmul.f32 %v2773_v6, %v3234_v38  ;;  %v4182_v61 = vld [vmem:[#allocation14_spill] sm:$0xff] }
  0xdc   : > { %v2142_v48 = vmax.f32 %v2110_v9, 0.0  ;;  %v746_v24 = vadd.f32 %v666_v45, %v504_v27  ;;  %v747_v36 = vadd.f32 %v668_v15, %v505_v50  ;;  %v908_v1 = vsel %vm855_vm3, %v906_v39, %v907_v55 }
  0xdd   : > { %v2143_v26 = vmax.f32 %v2111_v34, 0.0  ;;  %v909_v52 = vrot.slane %v791_v59, 2  ;;  %v1022_v21 = vmul.f32 %v2773_v6, %v3240_v40  ;;  %v1096_v56 = vmul.f32 %v2778_v10, %v3234_v38  ;;  %v4183_v34 = vld [vmem:[#allocation13_spill] sm:$0xff] }
  0xde   : > { %v988_v41 = vadd.f32 %v908_v1, %v746_v24  ;;  %v1097_v63 = vmul.f32 %v2778_v10, %v3240_v40  ;;  %v1098_v29 = vmul.f32 %v2778_v10, %v3243_v44  ;;  %v1337_v27 = vmul.f32 %v2780_v11, %v3234_v38 }
  0xdf   : > { %v2168_v50 = vpack.c.bf16 %v2143_v26, %v2142_v48  ;;  %v910_v2 = vsel %vm855_vm3, %v907_v55, %v909_v52  ;;  %v1212_v7 = vrot.slane %v1096_v56, 1  ;;  %v1338_v31 = vmul.f32 %v2780_v11, %v3240_v40  ;;  %v4184_v26 = vld [vmem:[#allocation17_spill] sm:$0xff]  ;;  %v3582_v56 = vld [vmem:[%s2769_s15 + $0xf0] sm:$0xff] }
  0xe0   : > { %v989_v58 = vadd.f32 %v910_v2, %v747_v36  ;;  %v1053_v54 = vadd.f32 %v1021_v18, %v988_v41  ;;  %v1213_v28 = vrot.slane %v1097_v63, 1  ;;  %v1215_v0 = vrot.slane %v1098_v29, 1 }
  0xe1   : > { %2503 = vmatmul.msk.bf16.gmra.mxu1 %vm2183_vm4, %v2168_v50  ;;  %v1339_v25 = vmul.f32 %v2780_v11, %v3243_v44  ;;  %v1453_v17 = vrot.slane %v1337_v27, 2  ;;  %v1454_v43 = vrot.slane %v1338_v31, 2  ;;  %v1568_v9 = vmul.f32 %v2782_v12, %v4182_v61 }
  0xe2   : > { %v1054_v59 = vadd.f32 %v1022_v21, %v989_v58  ;;  %v1214_v39 = vsel %vm613_vm2, %v1212_v7, %v1213_v28  ;;  %v1216_v55 = vsel %vm613_vm2, %v1213_v28, %v1215_v0  ;;  %v1569_v45 = vmul.f32 %v2782_v12, %v4183_v34  ;;  %v3590_v58 = vld [vmem:[%s2769_s15 + $0xf8] sm:$0xff] }
  0xe3   : > { %v1294_v15 = vadd.f32 %v1214_v39, %v1053_v54  ;;  %v1455_v18 = vsel %vm855_vm3, %v1453_v17, %v1454_v43  ;;  %v1456_v48 = vrot.slane %v1339_v25, 2  ;;  %v1643_v24 = vmul.f32 %v2787_v22, %v4182_v61 }
  0xe4   : > { %v1295_v36 = vadd.f32 %v1216_v55, %v1054_v59  ;;  %v1644_v1 = vmul.f32 %v2787_v22, %v4183_v34  ;;  %v1645_v52 = vmul.f32 %v2787_v22, %v4184_v26  ;;  %v1884_v21 = vmul.f32 %v3374_v62, %v4182_v61 }
  0xe5   : > { %v1457_v41 = vsel %vm855_vm3, %v1454_v43, %v1456_v48  ;;  %v1535_v63 = vadd.f32 %v1455_v18, %v1294_v15  ;;  %v1759_v29 = vrot.slane %v1643_v24, 1  ;;  %v1885_v27 = vmul.f32 %v3374_v62, %v4183_v34 }
  0xe6   : > { %v1536_v50 = vadd.f32 %v1457_v41, %v1295_v36  ;;  %v1760_v2 = vrot.slane %v1644_v1, 1  ;;  %v1762_v7 = vrot.slane %v1645_v52, 1  ;;  %v1886_v31 = vmul.f32 %v3374_v62, %v4184_v26 }
  0xe7   : > { %v1600_v54 = vadd.f32 %v1568_v9, %v1535_v63  ;;  %v2000_v28 = vrot.slane %v1884_v21, 2  ;;  %v2001_v0 = vrot.slane %v1885_v27, 2  ;;  %v385_v25 = vrot.slane %v3582_v56, 7 }
  0xe8   : > { %v1601_v17 = vadd.f32 %v1569_v45, %v1536_v50  ;;  %v1761_v43 = vsel %vm613_vm2, %v1759_v29, %v1760_v2  ;;  %v1763_v59 = vsel %vm613_vm2, %v1760_v2, %v1762_v7  ;;  %v2003_v39 = vrot.slane %v1886_v31, 2 }
  0xe9   : > { %v1841_v55 = vadd.f32 %v1761_v43, %v1600_v54  ;;  %v2002_v15 = vsel %vm855_vm3, %v2000_v28, %v2001_v0  ;;  %v386_v18 = vrot.slane %v3590_v58, 7  ;;  %v3598_v48 = vsel %vm336_vm1, 0.0, %v385_v25 }
  0xea   : > { %v1842_v24 = vadd.f32 %v1763_v59, %v1601_v17  ;;  %v2004_v9 = vsel %vm855_vm3, %v2001_v0, %v2003_v39  ;;  %v512_v36 = vmul.f32 %v2762_v3, %v3001_v51  ;;  %v513_v45 = vmul.f32 %v2762_v3, %v3005_v53 }
  0xeb   : > { %v2082_v1 = vadd.f32 %v2002_v15, %v1841_v55  ;;  %v3606_v52 = vsel %vm336_vm1, %v385_v25, %v386_v18  ;;  %v3609_v21 = vsel %vm336_vm1, %v386_v18, 0.0  ;;  %v559_v41 = vmul.f32 %v2764_v4, %v3001_v51 }
  0xec   : > { %v2083_v63 = vadd.f32 %v2004_v9, %v1842_v24  ;;  %v560_v29 = vmul.f32 %v2764_v4, %v3005_v53  ;;  %v561_v27 = vmul.f32 %v2764_v4, %v3015_v57  ;;  %v801_v50 = vmul.f32 %v2771_v5, %v3001_v51 }
  0xed   : > { %v2118_v2 = vadd.f32 %v3415_v49, %v2082_v1  ;;  %v684_v7 = vrot.slane %v559_v41, 1  ;;  %v802_v31 = vmul.f32 %v2771_v5, %v3005_v53  ;;  %v803_v54 = vmul.f32 %v2771_v5, %v3015_v57 }
  0xee   : > { %v2119_v28 = vadd.f32 %v3415_v49, %v2083_v63  ;;  %v685_v0 = vrot.slane %v560_v29, 1  ;;  %v687_v25 = vrot.slane %v561_v27, 1  ;;  %v926_v17 = vrot.slane %v801_v50, 2 }
  0xef   : > { %v2150_v43 = vmax.f32 %v2118_v2, 0.0  ;;  %v927_v59 = vrot.slane %v802_v31, 2  ;;  %v929_v39 = vrot.slane %v803_v54, 2  ;;  %v1029_v51 = vmul.f32 %v2773_v6, %v3307_v47 }
  0xf0   : > { %v2151_v55 = vmax.f32 %v2119_v28, 0.0  ;;  %v686_v15 = vsel %vm613_vm2, %v684_v7, %v685_v0  ;;  %v688_v18 = vsel %vm613_vm2, %v685_v0, %v687_v25  ;;  %v1030_v53 = vmul.f32 %v2773_v6, %v3312_v30 }
  0xf1   : > { %v754_v57 = vadd.f32 %v686_v15, %v512_v36  ;;  %v755_v24 = vadd.f32 %v688_v18, %v513_v45  ;;  %v928_v9 = vsel %vm855_vm3, %v926_v17, %v927_v59  ;;  %v930_v1 = vsel %vm855_vm3, %v927_v59, %v929_v39 }
  0xf2   : > { %v2172_v41 = vpack.c.bf16 %v2151_v55, %v2150_v43  ;;  %v1108_v63 = vmul.f32 %v2778_v10, %v3307_v47  ;;  %v1109_v29 = vmul.f32 %v2778_v10, %v3312_v30  ;;  %v1110_v27 = vmul.f32 %v2778_v10, %v3315_v60 }
  0xf3   : > { %v996_v50 = vadd.f32 %v928_v9, %v754_v57  ;;  %v997_v2 = vadd.f32 %v930_v1, %v755_v24  ;;  %v1349_v36 = vmul.f32 %v2780_v11, %v3307_v47  ;;  %v1350_v45 = vmul.f32 %v2780_v11, %v3312_v30 }
  0xf4   : > { %2507 = vmatmul.msk.bf16.gmra.mxu2 %vm2183_vm4, %v2172_v41  ;;  %v1232_v7 = vrot.slane %v1108_v63, 1  ;;  %v1233_v31 = vrot.slane %v1109_v29, 1  ;;  %v1235_v54 = vrot.slane %v1110_v27, 1  ;;  %v1351_v28 = vmul.f32 %v2780_v11, %v3315_v60 }
  0xf5   : > { %v1061_v0 = vadd.f32 %v1029_v51, %v996_v50  ;;  %v1062_v25 = vadd.f32 %v1030_v53, %v997_v2  ;;  %v1473_v17 = vrot.slane %v1349_v36, 2  ;;  %v1474_v43 = vrot.slane %v1350_v45, 2 }
  0xf6   : > { %v1234_v59 = vsel %vm613_vm2, %v1232_v7, %v1233_v31  ;;  %v1236_v39 = vsel %vm613_vm2, %v1233_v31, %v1235_v54  ;;  %v1476_v55 = vrot.slane %v1351_v28, 2  ;;  %v1576_v15 = vmul.f32 %v2782_v12, %v3598_v48 }
  0xf7   : > { %v1302_v18 = vadd.f32 %v1234_v59, %v1061_v0  ;;  %v1303_v57 = vadd.f32 %v1236_v39, %v1062_v25  ;;  %v1475_v24 = vsel %vm855_vm3, %v1473_v17, %v1474_v43  ;;  %v1577_v9 = vmul.f32 %v2782_v12, %v3606_v52 }
  0xf8   : > { %v1477_v51 = vsel %vm855_vm3, %v1474_v43, %v1476_v55  ;;  %v1655_v53 = vmul.f32 %v2787_v22, %v3598_v48  ;;  %v1656_v1 = vmul.f32 %v2787_v22, %v3606_v52  ;;  %v1657_v41 = vmul.f32 %v2787_v22, %v3609_v21 }
  0xf9   : > { %v1543_v63 = vadd.f32 %v1475_v24, %v1302_v18  ;;  %v1544_v29 = vadd.f32 %v1477_v51, %v1303_v57  ;;  %v1896_v27 = vmul.f32 %v3374_v62, %v3598_v48  ;;  %v1897_v50 = vmul.f32 %v3374_v62, %v3606_v52 }
  0xfa   : > { %v1779_v2 = vrot.slane %v1655_v53, 1  ;;  %v1780_v36 = vrot.slane %v1656_v1, 1  ;;  %v1782_v45 = vrot.slane %v1657_v41, 1  ;;  %v1898_v7 = vmul.f32 %v3374_v62, %v3609_v21 }
  0xfb   : > { %v1608_v31 = vadd.f32 %v1576_v15, %v1543_v63  ;;  %v1609_v54 = vadd.f32 %v1577_v9, %v1544_v29  ;;  %v2020_v28 = vrot.slane %v1896_v27, 2  ;;  %v2021_v0 = vrot.slane %v1897_v50, 2 }
  0xfc   : > { %v1781_v25 = vsel %vm613_vm2, %v1779_v2, %v1780_v36  ;;  %v1783_v17 = vsel %vm613_vm2, %v1780_v36, %v1782_v45  ;;  %v2023_v43 = vrot.slane %v1898_v7, 2  ;;  %v488_v59 = vmul.f32 %v2762_v3, %v3091_v16 }
  0xfd   : > { %v1849_v39 = vadd.f32 %v1781_v25, %v1608_v31  ;;  %v1850_v55 = vadd.f32 %v1783_v17, %v1609_v54  ;;  %v2022_v18 = vsel %vm855_vm3, %v2020_v28, %v2021_v0  ;;  %v489_v57 = vmul.f32 %v2762_v3, %v3096_v23 }
  0xfe   : > { %v2024_v15 = vsel %vm855_vm3, %v2021_v0, %v2023_v43  ;;  %v523_v24 = vmul.f32 %v2764_v4, %v3091_v16  ;;  %v524_v9 = vmul.f32 %v2764_v4, %v3096_v23  ;;  %v525_v51 = vmul.f32 %v2764_v4, %v3103_v33 }
  0xff   : > { %v2090_v53 = vadd.f32 %v2022_v18, %v1849_v39  ;;  %v2091_v1 = vadd.f32 %v2024_v15, %v1850_v55  ;;  %v765_v41 = vmul.f32 %v2771_v5, %v3091_v16  ;;  %v766_v63 = vmul.f32 %v2771_v5, %v3096_v23 }
 0x100   : > { %v624_v29 = vrot.slane %v523_v24, 1  ;;  %v625_v27 = vrot.slane %v524_v9, 1  ;;  %v627_v50 = vrot.slane %v525_v51, 1  ;;  %v767_v2 = vmul.f32 %v2771_v5, %v3103_v33 }
 0x101   : > { %v2126_v36 = vadd.f32 %v3415_v49, %v2090_v53  ;;  %v2127_v45 = vadd.f32 %v3415_v49, %v2091_v1  ;;  %v866_v7 = vrot.slane %v765_v41, 2  ;;  %v867_v31 = vrot.slane %v766_v63, 2 }
 0x102   : > { %v626_v54 = vsel %vm613_vm2, %v624_v29, %v625_v27  ;;  %v628_v28 = vsel %vm613_vm2, %v625_v27, %v627_v50  ;;  %v869_v16 = vrot.slane %v767_v2, 2  ;;  %v1005_v23 = vmul.f32 %v2773_v6, %v3386_v20 }
 0x103   : > { %v2158_v0 = vmax.f32 %v2126_v36, 0.0  ;;  %v2159_v25 = vmax.f32 %v2127_v45, 0.0  ;;  %v730_v17 = vadd.f32 %v626_v54, %v488_v59  ;;  %v731_v43 = vadd.f32 %v628_v28, %v489_v57  ;;  %v4185_v45 = vld [vmem:[#allocation6_spill] sm:$0xff]  ;;  %v4186_v28 = vld [vmem:[#allocation5_spill] sm:$0xff] }
 0x104   : > { %v868_v33 = vsel %vm855_vm3, %v866_v7, %v867_v31  ;;  %v870_v39 = vsel %vm855_vm3, %v867_v31, %v869_v16  ;;  %v1006_v55 = vmul.f32 %v2773_v6, %v3391_v46  ;;  %v1072_v18 = vmul.f32 %v2778_v10, %v3386_v20 }
 0x105   : > { %v2176_v15 = vpack.c.bf16 %v2159_v25, %v2158_v0  ;;  %v972_v24 = vadd.f32 %v868_v33, %v730_v17  ;;  %v973_v9 = vadd.f32 %v870_v39, %v731_v43  ;;  %v1073_v51 = vmul.f32 %v2778_v10, %v3391_v46 }
 0x106   : > { %v1074_v59 = vmul.f32 %v2778_v10, %v3394_v42  ;;  %v1172_v57 = vrot.slane %v1072_v18, 1  ;;  %v1313_v53 = vmul.f32 %v2780_v11, %v3386_v20  ;;  %v1314_v1 = vmul.f32 %v2780_v11, %v3391_v46 }
 0x107   : > { %2511 = vmatmul.msk.bf16.gmra.mxu3 %vm2183_vm4, %v2176_v15  ;;  %v1037_v41 = vadd.f32 %v1005_v23, %v972_v24  ;;  %v1038_v63 = vadd.f32 %v1006_v55, %v973_v9  ;;  %v1173_v29 = vrot.slane %v1073_v51, 1  ;;  %v1315_v27 = vmul.f32 %v2780_v11, %v3394_v42  ;;  %v4187_v55 = vld [vmem:[#allocation8_spill] sm:$0xff] }
 0x108   : > { %v1175_v50 = vrot.slane %v1074_v59, 1  ;;  %v1413_v2 = vrot.slane %v1313_v53, 2  ;;  %v1414_v36 = vrot.slane %v1314_v1, 2  ;;  %v1552_v7 = vmul.f32 %v2782_v12, %v4185_v45 }
 0x109   : > { %v1174_v31 = vsel %vm613_vm2, %v1172_v57, %v1173_v29  ;;  %v1416_v54 = vrot.slane %v1315_v27, 2  ;;  %v1553_v16 = vmul.f32 %v2782_v12, %v4186_v28  ;;  %v1619_v23 = vmul.f32 %v2787_v22, %v4185_v45 }
 0x10a   : > { %v1176_v0 = vsel %vm613_vm2, %v1173_v29, %v1175_v50  ;;  %v1278_v25 = vadd.f32 %v1174_v31, %v1037_v41  ;;  %v1415_v17 = vsel %vm855_vm3, %v1413_v2, %v1414_v36  ;;  %v1620_v43 = vmul.f32 %v2787_v22, %v4186_v28 }
 0x10b   : > { %v1279_v33 = vadd.f32 %v1176_v0, %v1038_v63  ;;  %v1417_v39 = vsel %vm855_vm3, %v1414_v36, %v1416_v54  ;;  %v1621_v18 = vmul.f32 %v2787_v22, %v4187_v55  ;;  %v1719_v15 = vrot.slane %v1619_v23, 1 }
 0x10c   : > { %v1519_v24 = vadd.f32 %v1415_v17, %v1278_v25  ;;  %v1720_v9 = vrot.slane %v1620_v43, 1  ;;  %v1860_v51 = vmul.f32 %v3374_v62, %v4185_v45  ;;  %v1861_v59 = vmul.f32 %v3374_v62, %v4186_v28 }
 0x10d   : > { %v1520_v57 = vadd.f32 %v1417_v39, %v1279_v33  ;;  %v1722_v53 = vrot.slane %v1621_v18, 1  ;;  %v1862_v1 = vmul.f32 %v3374_v62, %v4187_v55  ;;  %v498_v41 = vmul.f32 %v2762_v3, %v3159_v32 }
 0x10e   : > { %v1584_v63 = vadd.f32 %v1552_v7, %v1519_v24  ;;  %v1721_v29 = vsel %vm613_vm2, %v1719_v15, %v1720_v9  ;;  %v1960_v27 = vrot.slane %v1860_v51, 2  ;;  %v1961_v50 = vrot.slane %v1861_v59, 2 }
 0x10f   : > { %v1585_v2 = vadd.f32 %v1553_v16, %v1520_v57  ;;  %v1723_v36 = vsel %vm613_vm2, %v1720_v9, %v1722_v53  ;;  %v1963_v31 = vrot.slane %v1862_v1, 2  ;;  %v499_v54 = vmul.f32 %v2762_v3, %v3166_v35 }
 0x110   : > { %v1825_v23 = vadd.f32 %v1721_v29, %v1584_v63  ;;  %v1962_v0 = vsel %vm855_vm3, %v1960_v27, %v1961_v50  ;;  %v538_v25 = vmul.f32 %v2764_v4, %v3159_v32  ;;  %v539_v7 = vmul.f32 %v2764_v4, %v3166_v35 }
 0x111   : > { %v1826_v17 = vadd.f32 %v1723_v36, %v1585_v2  ;;  %v1964_v43 = vsel %vm855_vm3, %v1961_v50, %v1963_v31  ;;  %v540_v16 = vmul.f32 %v2764_v4, %v3169_v37  ;;  %v780_v33 = vmul.f32 %v2771_v5, %v3159_v32 }
 0x112   : > { %v2066_v39 = vadd.f32 %v1962_v0, %v1825_v23  ;;  %v649_v18 = vrot.slane %v538_v25, 1  ;;  %v650_v15 = vrot.slane %v539_v7, 1  ;;  %v781_v24 = vmul.f32 %v2771_v5, %v3166_v35 }
 0x113   : > { %v2067_v9 = vadd.f32 %v1964_v43, %v1826_v17  ;;  %v652_v51 = vrot.slane %v540_v16, 1  ;;  %v782_v59 = vmul.f32 %v2771_v5, %v3169_v37  ;;  %v891_v57 = vrot.slane %v780_v33, 2 }
 0x114   : > { %v2102_v53 = vadd.f32 %v3415_v49, %v2066_v39  ;;  %v651_v1 = vsel %vm613_vm2, %v649_v18, %v650_v15  ;;  %v892_v63 = vrot.slane %v781_v24, 2  ;;  %v1015_v32 = vmul.f32 %v2773_v6, %v2899_v13 }
 0x115   : > { %v2103_v29 = vadd.f32 %v3415_v49, %v2067_v9  ;;  %v653_v27 = vsel %vm613_vm2, %v650_v15, %v652_v51  ;;  %v740_v50 = vadd.f32 %v651_v1, %v498_v41  ;;  %v894_v35 = vrot.slane %v782_v59, 2 }
 0x116   : > { %v2134_v2 = vmax.f32 %v2102_v53, 0.0  ;;  %v741_v36 = vadd.f32 %v653_v27, %v499_v54  ;;  %v893_v31 = vsel %vm855_vm3, %v891_v57, %v892_v63  ;;  %v1016_v37 = vmul.f32 %v2773_v6, %v2893_v8 }
 0x117   : > { %v2135_v23 = vmax.f32 %v2103_v29, 0.0  ;;  %v895_v0 = vsel %vm855_vm3, %v892_v63, %v894_v35  ;;  %v982_v25 = vadd.f32 %v893_v31, %v740_v50  ;;  %v1087_v7 = vmul.f32 %v2778_v10, %v2899_v13 }
 0x118   : > { %v983_v17 = vadd.f32 %v895_v0, %v741_v36  ;;  %v1088_v43 = vmul.f32 %v2778_v10, %v2893_v8  ;;  %v1089_v41 = vmul.f32 %v2778_v10, %v2911_v19  ;;  %v1328_v54 = vmul.f32 %v2780_v11, %v2899_v13  ;;  %v4188_v13 = vld [vmem:[#allocation11_spill] sm:$0xff]  ;;  %v4189_v36 = vld [vmem:[#allocation12_spill] sm:$0xff] }
 0x119   : > { %v2164_v16 = vpack.c.bf16 %v2135_v23, %v2134_v2  ;;  %v1047_v33 = vadd.f32 %v1015_v32, %v982_v25  ;;  %v1197_v39 = vrot.slane %v1087_v7, 1  ;;  %v1329_v18 = vmul.f32 %v2780_v11, %v2893_v8 }
 0x11a   : > { %v1048_v15 = vadd.f32 %v1016_v37, %v983_v17  ;;  %v1198_v24 = vrot.slane %v1088_v43, 1  ;;  %v1200_v9 = vrot.slane %v1089_v41, 1  ;;  %v1330_v51 = vmul.f32 %v2780_v11, %v2911_v19 }
 0x11b   : > { %2499 = vmatmul.msk.bf16.gmra.mxu0 %vm2183_vm4, %v2164_v16  ;;  %v1438_v59 = vrot.slane %v1328_v54, 2  ;;  %v1439_v57 = vrot.slane %v1329_v18, 2  ;;  %v1562_v53 = vmul.f32 %v2782_v12, %v2902_v14  ;;  %v1563_v1 = vmul.f32 %v2782_v12, %v4188_v13 }
 0x11c   : > { %v1199_v63 = vsel %vm613_vm2, %v1197_v39, %v1198_v24  ;;  %v1201_v8 = vsel %vm613_vm2, %v1198_v24, %v1200_v9  ;;  %v1441_v32 = vrot.slane %v1330_v51, 2  ;;  %v1634_v29 = vmul.f32 %v2787_v22, %v2902_v14 }
 0x11d   : > { %v1288_v27 = vadd.f32 %v1199_v63, %v1047_v33  ;;  %v1289_v19 = vadd.f32 %v1201_v8, %v1048_v15  ;;  %v1440_v50 = vsel %vm855_vm3, %v1438_v59, %v1439_v57  ;;  %v1635_v35 = vmul.f32 %v2787_v22, %v4188_v13 }
 0x11e   : > { %v1442_v2 = vsel %vm855_vm3, %v1439_v57, %v1441_v32  ;;  %v1636_v31 = vmul.f32 %v2787_v22, %v4189_v36  ;;  %v1744_v37 = vrot.slane %v1634_v29, 1  ;;  %v1875_v23 = vmul.f32 %v3374_v62, %v2902_v14 }
 0x11f   : > { %v1529_v0 = vadd.f32 %v1440_v50, %v1288_v27  ;;  %v1530_v25 = vadd.f32 %v1442_v2, %v1289_v19  ;;  %v1745_v7 = vrot.slane %v1635_v35, 1  ;;  %v1876_v17 = vmul.f32 %v3374_v62, %v4188_v13 }
 0x120   : > { %v1747_v43 = vrot.slane %v1636_v31, 1  ;;  %v1877_v41 = vmul.f32 %v3374_v62, %v4189_v36  ;;  %v1985_v54 = vrot.slane %v1875_v23, 2  ;;  %v506_v16 = vmul.f32 %v2762_v3, %v3234_v38 }
 0x121   : > { %v1594_v33 = vadd.f32 %v1562_v53, %v1529_v0  ;;  %v1595_v39 = vadd.f32 %v1563_v1, %v1530_v25  ;;  %v1746_v18 = vsel %vm613_vm2, %v1744_v37, %v1745_v7  ;;  %v1986_v15 = vrot.slane %v1876_v17, 2 }
 0x122   : > { %v1748_v14 = vsel %vm613_vm2, %v1745_v7, %v1747_v43  ;;  %v1988_v24 = vrot.slane %v1877_v41, 2  ;;  %v507_v9 = vmul.f32 %v2762_v3, %v3240_v40  ;;  %v550_v51 = vmul.f32 %v2764_v4, %v3234_v38 }
 0x123   : > { %v1835_v59 = vadd.f32 %v1746_v18, %v1594_v33  ;;  %v1836_v62 = vadd.f32 %v1748_v14, %v1595_v39  ;;  %v1987_v57 = vsel %vm855_vm3, %v1985_v54, %v1986_v15  ;;  %v551_v53 = vmul.f32 %v2764_v4, %v3240_v40 }
 0x124   : > { %v1989_v13 = vsel %vm855_vm3, %v1986_v15, %v1988_v24  ;;  %v552_v1 = vmul.f32 %v2764_v4, %v3243_v44  ;;  %v669_v63 = vrot.slane %v550_v51, 1  ;;  %v792_v8 = vmul.f32 %v2771_v5, %v3234_v38 }
 0x125   : > { %v2076_v32 = vadd.f32 %v1987_v57, %v1835_v59  ;;  %v2077_v29 = vadd.f32 %v1989_v13, %v1836_v62  ;;  %v670_v27 = vrot.slane %v551_v53, 1  ;;  %v793_v19 = vmul.f32 %v2771_v5, %v3240_v40 }
 0x126   : > { %v672_v50 = vrot.slane %v552_v1, 1  ;;  %v794_v35 = vmul.f32 %v2771_v5, %v3243_v44  ;;  %v911_v2 = vrot.slane %v792_v8, 2  ;;  %v1023_v36 = vmul.f32 %v2773_v6, %v4182_v61  ;;  %v4190_v8 = vld [vmem:[#allocation16_spill] sm:$0xff] }
 0x127   : > { %v2112_v31 = vadd.f32 %v3415_v49, %v2076_v32  ;;  %v2113_v37 = vadd.f32 %v3415_v49, %v2077_v29  ;;  %v671_v38 = vsel %vm613_vm2, %v669_v63, %v670_v27  ;;  %v912_v23 = vrot.slane %v793_v19, 2  ;;  %v4191_v32 = vld [vmem:[#allocation15_spill] sm:$0xff] }
 0x128   : > { %v673_v0 = vsel %vm613_vm2, %v670_v27, %v672_v50  ;;  %v748_v25 = vadd.f32 %v671_v38, %v506_v16  ;;  %v914_v7 = vrot.slane %v794_v35, 2  ;;  %v1024_v40 = vmul.f32 %v2773_v6, %v4183_v34 }
 0x129   : > { %v2144_v17 = vmax.f32 %v2112_v31, 0.0  ;;  %v2145_v44 = vmax.f32 %v2113_v37, 0.0  ;;  %v749_v43 = vadd.f32 %v673_v0, %v507_v9  ;;  %v913_v41 = vsel %vm855_vm3, %v911_v2, %v912_v23  ;;  %v3852_v0 = vld [vmem:[%s4133_s1 + $0x8] ss:$0 sm:$0xff] }
 0x12a   : > { %v915_v54 = vsel %vm855_vm3, %v912_v23, %v914_v7  ;;  %v990_v33 = vadd.f32 %v913_v41, %v748_v25  ;;  %v1099_v49 = vmul.f32 %v2778_v10, %v4182_v61  ;;  %v1100_v39 = vmul.f32 %v2778_v10, %v4183_v34 }
 0x12b   : > { %v2169_v18 = vpack.c.bf16 %v2145_v44, %v2144_v17  ;;  %v991_v16 = vadd.f32 %v915_v54, %v749_v43  ;;  %v1101_v15 = vmul.f32 %v2778_v10, %v4184_v26  ;;  %v1340_v14 = vmul.f32 %v2780_v11, %v4182_v61 }
 0x12c   : > { %v1055_v24 = vadd.f32 %v1023_v36, %v990_v33  ;;  %v1217_v9 = vrot.slane %v1099_v49, 1  ;;  %v1218_v51 = vrot.slane %v1100_v39, 1  ;;  %v1341_v59 = vmul.f32 %v2780_v11, %v4183_v34  ;;  %v4192_v36 = vld [vmem:[#allocation18_spill] sm:$0xff] }
 0x12d   : > { %2504 = vmatmul.msk.bf16.gmra.mxu1 %vm2183_vm4, %v2169_v18  ;;  %v1056_v62 = vadd.f32 %v1024_v40, %v991_v16  ;;  %v1220_v57 = vrot.slane %v1101_v15, 1  ;;  %v1342_v53 = vmul.f32 %v2780_v11, %v4184_v26  ;;  %v1458_v13 = vrot.slane %v1340_v14, 2 }
 0x12e   : > { %v1219_v1 = vsel %vm613_vm2, %v1217_v9, %v1218_v51  ;;  %v1459_v63 = vrot.slane %v1341_v59, 2  ;;  %v1570_v61 = vmul.f32 %v2782_v12, %v4190_v8  ;;  %v1571_v29 = vmul.f32 %v2782_v12, %v4191_v32 }
 0x12f   : > { %v1221_v27 = vsel %vm613_vm2, %v1218_v51, %v1220_v57  ;;  %v1296_v34 = vadd.f32 %v1219_v1, %v1055_v24  ;;  %v1461_v19 = vrot.slane %v1342_v53, 2  ;;  %v1646_v50 = vmul.f32 %v2787_v22, %v4190_v8 }
 0x130   : > { %v1297_v35 = vadd.f32 %v1221_v27, %v1056_v62  ;;  %v1460_v26 = vsel %vm855_vm3, %v1458_v13, %v1459_v63  ;;  %v1647_v2 = vmul.f32 %v2787_v22, %v4191_v32  ;;  %v1648_v31 = vmul.f32 %v2787_v22, %v4192_v36 }
 0x131   : > { %v1462_v37 = vsel %vm855_vm3, %v1459_v63, %v1461_v19  ;;  %v1537_v38 = vadd.f32 %v1460_v26, %v1296_v34  ;;  %v1764_v23 = vrot.slane %v1646_v50, 1  ;;  %v1887_v25 = vmul.f32 %v3852_v0, %v4190_v8 }
 0x132   : > { %v1538_v7 = vadd.f32 %v1462_v37, %v1297_v35  ;;  %v1765_v40 = vrot.slane %v1647_v2, 1  ;;  %v1767_v17 = vrot.slane %v1648_v31, 1  ;;  %v1888_v44 = vmul.f32 %v3852_v0, %v4191_v32  ;;  %v3880_v32 = vld [vmem:[%s4134_s2] ss:$0 sm:$0xff] }
 0x133   : > { %v1602_v43 = vadd.f32 %v1570_v61, %v1537_v38  ;;  %v1889_v41 = vmul.f32 %v3852_v0, %v4192_v36  ;;  %v2005_v54 = vrot.slane %v1887_v25, 2  ;;  %v298_v33 = vmul.f32 0.0, %v3582_v56 }
 0x134   : > { %v1603_v49 = vadd.f32 %v1571_v29, %v1538_v7  ;;  %v1766_v39 = vsel %vm613_vm2, %v1764_v23, %v1765_v40  ;;  %v1768_v18 = vsel %vm613_vm2, %v1765_v40, %v1767_v17  ;;  %v2006_v16 = vrot.slane %v1888_v44, 2 }
 0x135   : > { %v1843_v15 = vadd.f32 %v1766_v39, %v1602_v43  ;;  %v2008_v14 = vrot.slane %v1889_v41, 2  ;;  %v299_v24 = vmul.f32 0.0, %v3590_v58  ;;  %v388_v9 = vrot.slane %v298_v33, 7 }
 0x136   : > { %v1844_v51 = vadd.f32 %v1768_v18, %v1603_v49  ;;  %v2007_v59 = vsel %vm855_vm3, %v2005_v54, %v2006_v16  ;;  %v514_v62 = vmul.f32 %v2762_v3, %v3307_v47  ;;  %v515_v56 = vmul.f32 %v2762_v3, %v3312_v30 }
 0x137   : > { %v2009_v57 = vsel %vm855_vm3, %v2006_v16, %v2008_v14  ;;  %v2084_v53 = vadd.f32 %v2007_v59, %v1843_v15  ;;  %v389_v13 = vrot.slane %v299_v24, 7  ;;  %v462_v1 = vsel %vm336_vm1, 0.0, %v388_v9 }
 0x138   : > { %v2085_v63 = vadd.f32 %v2009_v57, %v1844_v51  ;;  %v562_v58 = vmul.f32 %v2764_v4, %v3307_v47  ;;  %v563_v8 = vmul.f32 %v2764_v4, %v3312_v30  ;;  %v564_v61 = vmul.f32 %v2764_v4, %v3315_v60 }
 0x139   : > { %v2120_v29 = vadd.f32 %v3880_v32, %v2084_v53  ;;  %v390_v27 = vsel %vm336_vm1, %v388_v9, %v389_v13  ;;  %v480_v34 = vsel %vm336_vm1, %v389_v13, 0.0  ;;  %v804_v19 = vmul.f32 %v2771_v5, %v3307_v47 }
 0x13a   : > { %v2121_v50 = vadd.f32 %v3880_v32, %v2085_v63  ;;  %v689_v35 = vrot.slane %v562_v58, 1  ;;  %v690_v26 = vrot.slane %v563_v8, 1  ;;  %v692_v2 = vrot.slane %v564_v61, 1 }
 0x13b   : > { %v2152_v36 = vmax.f32 %v2120_v29, 0.0  ;;  %v805_v31 = vmul.f32 %v2771_v5, %v3312_v30  ;;  %v806_v37 = vmul.f32 %v2771_v5, %v3315_v60  ;;  %v931_v38 = vrot.slane %v804_v19, 2 }
 0x13c   : > { %v2153_v23 = vmax.f32 %v2121_v50, 0.0  ;;  %v691_v25 = vsel %vm613_vm2, %v689_v35, %v690_v26  ;;  %v693_v7 = vsel %vm613_vm2, %v690_v26, %v692_v2  ;;  %v1031_v47 = vmul.f32 %v2773_v6, %v3598_v48 }
 0x13d   : > { %v756_v40 = vadd.f32 %v691_v25, %v514_v62  ;;  %v757_v17 = vadd.f32 %v693_v7, %v515_v56  ;;  %v932_v44 = vrot.slane %v805_v31, 2  ;;  %v934_v43 = vrot.slane %v806_v37, 2 }
 0x13e   : > { %v2173_v41 = vpack.c.bf16 %v2153_v23, %v2152_v36  ;;  %v1032_v30 = vmul.f32 %v2773_v6, %v3606_v52  ;;  %v1111_v60 = vmul.f32 %v2778_v10, %v3598_v48  ;;  %v1112_v54 = vmul.f32 %v2778_v10, %v3606_v52 }
 0x13f   : > { %v933_v33 = vsel %vm855_vm3, %v931_v38, %v932_v44  ;;  %v935_v49 = vsel %vm855_vm3, %v932_v44, %v934_v43  ;;  %v1113_v39 = vmul.f32 %v2778_v10, %v3609_v21  ;;  %v1352_v18 = vmul.f32 %v2780_v11, %v3598_v48 }
 0x140   : > { %2508 = vmatmul.msk.bf16.gmra.mxu2 %vm2183_vm4, %v2173_v41  ;;  %v998_v16 = vadd.f32 %v933_v33, %v756_v40  ;;  %v999_v15 = vadd.f32 %v935_v49, %v757_v17  ;;  %v1237_v14 = vrot.slane %v1111_v60, 1  ;;  %v1238_v24 = vrot.slane %v1112_v54, 1  ;;  %v3927_v40 = vpop.f32.mrf.mxu0  ;;  %v3932_v41 = vpop.f32.mrf.mxu2 }
 0x141   : > { %v1240_v9 = vrot.slane %v1113_v39, 1  ;;  %v1353_v51 = vmul.f32 %v2780_v11, %v3606_v52  ;;  %v1354_v59 = vmul.f32 %v2780_v11, %v3609_v21  ;;  %v1478_v62 = vrot.slane %v1352_v18, 2 }
 0x142   : > { %v1063_v56 = vadd.f32 %v1031_v47, %v998_v16  ;;  %v1064_v57 = vadd.f32 %v1032_v30, %v999_v15  ;;  %v1239_v53 = vsel %vm613_vm2, %v1237_v14, %v1238_v24  ;;  %v1578_v48 = vmul.f32 %v2782_v12, %v462_v1  ;;  %v3925_v47 = vpop.f32.mrf.mxu1  ;;  %v3934_v30 = vpop.f32.mrf.mxu3 }
 0x143   : > { %v1241_v13 = vsel %vm613_vm2, %v1238_v24, %v1240_v9  ;;  %v1479_v63 = vrot.slane %v1353_v51, 2  ;;  %v1481_v58 = vrot.slane %v1354_v59, 2  ;;  %v1579_v8 = vmul.f32 %v2782_v12, %v390_v27 }
 0x144   : > { %v1304_v61 = vadd.f32 %v1239_v53, %v1063_v56  ;;  %v1305_v29 = vadd.f32 %v1241_v13, %v1064_v57  ;;  %v1658_v52 = vmul.f32 %v2787_v22, %v462_v1  ;;  %v1659_v19 = vmul.f32 %v2787_v22, %v390_v27 }
 0x145   : > { %v1480_v21 = vsel %vm855_vm3, %v1478_v62, %v1479_v63  ;;  %v1482_v50 = vsel %vm855_vm3, %v1479_v63, %v1481_v58  ;;  %v1660_v35 = vmul.f32 %v2787_v22, %v480_v34  ;;  %v1899_v26 = vmul.f32 %v3852_v0, %v462_v1 }
 0x146   : > { %v1545_v2 = vadd.f32 %v1480_v21, %v1304_v61  ;;  %v1546_v36 = vadd.f32 %v1482_v50, %v1305_v29  ;;  %v1784_v31 = vrot.slane %v1658_v52, 1  ;;  %v1785_v37 = vrot.slane %v1659_v19, 1 }
 0x147   : > { %v1787_v38 = vrot.slane %v1660_v35, 1  ;;  %v1900_v23 = vmul.f32 %v3852_v0, %v390_v27  ;;  %v1901_v25 = vmul.f32 %v3852_v0, %v480_v34  ;;  %v2025_v7 = vrot.slane %v1899_v26, 2 }
 0x148   : > { %v1610_v17 = vadd.f32 %v1578_v48, %v1545_v2  ;;  %v1611_v44 = vadd.f32 %v1579_v8, %v1546_v36  ;;  %v1786_v43 = vsel %vm613_vm2, %v1784_v31, %v1785_v37  ;;  %v490_v1 = vmul.f32 %v2762_v3, %v3386_v20  ;;  %v3965_v21 = vpop.f32.mrf.mxu2 }
 0x149   : > { %v1788_v27 = vsel %vm613_vm2, %v1785_v37, %v1787_v38  ;;  %v2026_v60 = vrot.slane %v1900_v23, 2  ;;  %v2028_v34 = vrot.slane %v1901_v25, 2  ;;  %v491_v54 = vmul.f32 %v2762_v3, %v3391_v46 }
 0x14a   : > { %v1851_v33 = vadd.f32 %v1786_v43, %v1610_v17  ;;  %v1852_v49 = vadd.f32 %v1788_v27, %v1611_v44  ;;  %v526_v39 = vmul.f32 %v2764_v4, %v3386_v20  ;;  %v527_v18 = vmul.f32 %v2764_v4, %v3391_v46  ;;  %v3959_v29 = vpop.f32.mrf.mxu1  ;;  %v3967_v50 = vpop.f32.mrf.mxu3 }
 0x14b   : > { %v2027_v16 = vsel %vm855_vm3, %v2025_v7, %v2026_v60  ;;  %v2029_v15 = vsel %vm855_vm3, %v2026_v60, %v2028_v34  ;;  %v528_v14 = vmul.f32 %v2764_v4, %v3394_v42  ;;  %v768_v24 = vmul.f32 %v2771_v5, %v3386_v20 }
 0x14c   : > { %v2092_v9 = vadd.f32 %v2027_v16, %v1851_v33  ;;  %v2093_v3 = vadd.f32 %v2029_v15, %v1852_v49  ;;  %v629_v51 = vrot.slane %v526_v39, 1  ;;  %v630_v59 = vrot.slane %v527_v18, 1 }
 0x14d   : > { %v632_v62 = vrot.slane %v528_v14, 1  ;;  %v769_v56 = vmul.f32 %v2771_v5, %v3391_v46  ;;  %v770_v57 = vmul.f32 %v2771_v5, %v3394_v42  ;;  %v871_v53 = vrot.slane %v768_v24, 2  ;;  %v3961_v46 = vpop.f32.mrf.mxu0  ;;  %v3999_v14 = vld [vmem:[%s4136_s4] ss:$0 sm:$0xff] }
 0x14e   : > { %v2128_v48 = vadd.f32 %v3880_v32, %v2092_v9  ;;  %v2129_v13 = vadd.f32 %v3880_v32, %v2093_v3  ;;  %v631_v4 = vsel %vm613_vm2, %v629_v51, %v630_v59  ;;  %v1007_v20 = vmul.f32 %v2773_v6, %v4185_v45  ;;  %v4195_v51 = vld [vmem:[#allocation10_spill] sm:$0xff] }
 0x14f   : > { %v633_v63 = vsel %vm613_vm2, %v630_v59, %v632_v62  ;;  %v732_v58 = vadd.f32 %v631_v4, %v490_v1  ;;  %v872_v8 = vrot.slane %v769_v56, 2  ;;  %v874_v61 = vrot.slane %v770_v57, 2 }
 0x150   : > { %v2160_v5 = vmax.f32 %v2128_v48, 0.0  ;;  %v2161_v42 = vmax.f32 %v2129_v13, 0.0  ;;  %v733_v52 = vadd.f32 %v633_v63, %v491_v54  ;;  %v1008_v19 = vmul.f32 %v2773_v6, %v4186_v28  ;;  %v4193_v54 = vld [vmem:[#allocation7_spill] sm:$0xff]  ;;  %v2290_v56 = vpop.f32.mrf.mxu2 }
 0x151   : > { %v873_v35 = vsel %vm855_vm3, %v871_v53, %v872_v8  ;;  %v875_v26 = vsel %vm855_vm3, %v872_v8, %v874_v61  ;;  %v1075_v2 = vmul.f32 %v2778_v10, %v4185_v45  ;;  %v1076_v36 = vmul.f32 %v2778_v10, %v4186_v28 }
 0x152   : > { %v2177_v31 = vpack.c.bf16 %v2161_v42, %v2160_v5  ;;  %v974_v37 = vadd.f32 %v873_v35, %v732_v58  ;;  %v975_v38 = vadd.f32 %v875_v26, %v733_v52  ;;  %v1077_v6 = vmul.f32 %v2778_v10, %v4187_v55  ;;  %v2270_v24 = vpop.f32.mrf.mxu1  ;;  %v2310_v4 = vpop.f32.mrf.mxu3 }
 0x153   : > { %v1177_v23 = vrot.slane %v1075_v2, 1  ;;  %v1178_v25 = vrot.slane %v1076_v36, 1  ;;  %v1316_v7 = vmul.f32 %v2780_v11, %v4185_v45  ;;  %v1317_v17 = vmul.f32 %v2780_v11, %v4186_v28  ;;  %v4194_v28 = vld [vmem:[#allocation9_spill] sm:$0xff] }
 0x154   : > { %2512 = vmatmul.msk.bf16.gmra.mxu3 %vm2183_vm4, %v2177_v31  ;;  %v1039_v44 = vadd.f32 %v1007_v20, %v974_v37  ;;  %v1040_v43 = vadd.f32 %v1008_v19, %v975_v38  ;;  %v1180_v1 = vrot.slane %v1077_v6, 1  ;;  %v1318_v27 = vmul.f32 %v2780_v11, %v4187_v55 }
 0x155   : > { %v1179_v60 = vsel %vm613_vm2, %v1177_v23, %v1178_v25  ;;  %v1418_v10 = vrot.slane %v1316_v7, 2  ;;  %v1419_v34 = vrot.slane %v1317_v17, 2  ;;  %v1554_v33 = vmul.f32 %v2782_v12, %v4193_v54  ;;  %v2250_v9 = vpop.f32.mrf.mxu0 }
 0x156   : > { %v1181_v45 = vsel %vm613_vm2, %v1178_v25, %v1180_v1  ;;  %v1280_v49 = vadd.f32 %v1179_v60, %v1039_v44  ;;  %v1421_v39 = vrot.slane %v1318_v27, 2  ;;  %v1555_v18 = vmul.f32 %v2782_v12, %v4194_v28 }
 0x157   : > { %v1281_v16 = vadd.f32 %v1181_v45, %v1040_v43  ;;  %v1420_v15 = vsel %vm855_vm3, %v1418_v10, %v1419_v34  ;;  %v1622_v11 = vmul.f32 %v2787_v22, %v4193_v54  ;;  %v1623_v55 = vmul.f32 %v2787_v22, %v4194_v28 }
 0x158   : > { %v1422_v12 = vsel %vm855_vm3, %v1419_v34, %v1421_v39  ;;  %v1521_v3 = vadd.f32 %v1420_v15, %v1280_v49  ;;  %v1624_v59 = vmul.f32 %v2787_v22, %v4195_v51  ;;  %v1863_v62 = vmul.f32 %v3852_v0, %v4193_v54 }
 0x159   : > { %v1522_v57 = vadd.f32 %v1422_v12, %v1281_v16  ;;  %v1724_v53 = vrot.slane %v1622_v11, 1  ;;  %v1725_v48 = vrot.slane %v1623_v55, 1  ;;  %v1864_v13 = vmul.f32 %v3852_v0, %v4194_v28 }
 0x15a   : > { %v1586_v20 = vadd.f32 %v1554_v33, %v1521_v3  ;;  %v1727_v63 = vrot.slane %v1624_v59, 1  ;;  %v1865_v58 = vmul.f32 %v3852_v0, %v4195_v51  ;;  %v1965_v8 = vrot.slane %v1863_v62, 2  ;;  %v2272_v7 = vpop.f32.mrf.mxu1  ;;  %v2312_v39 = vpop.f32.mrf.mxu3 }
 0x15b   : > { %v1587_v22 = vadd.f32 %v1555_v18, %v1522_v57  ;;  %v1726_v61 = vsel %vm613_vm2, %v1724_v53, %v1725_v48  ;;  %v1966_v5 = vrot.slane %v1864_v13, 2  ;;  %v2266_v42 = vadd.f32 %v3999_v14, %v3925_v47 }
 0x15c   : > { %v1728_v52 = vsel %vm613_vm2, %v1725_v48, %v1727_v63  ;;  %v1827_v19 = vadd.f32 %v1726_v61, %v1586_v20  ;;  %v1968_v35 = vrot.slane %v1865_v58, 2  ;;  %v2246_v26 = vadd.f32 %v3999_v14, %v3927_v40 }
 0x15d   : > { %v1828_v2 = vadd.f32 %v1728_v52, %v1587_v22  ;;  %v1967_v36 = vsel %vm855_vm3, %v1965_v8, %v1966_v5  ;;  %v2333_v31 = vmax.f32 %v2266_v42, 0.0  ;;  %v2286_v0 = vadd.f32 %v3999_v14, %v3932_v41  ;;  %v2252_v60 = vpop.f32.mrf.mxu0 }
 0x15e   : > { %v1969_v37 = vsel %vm855_vm3, %v1966_v5, %v1968_v35  ;;  %v2068_v38 = vadd.f32 %v1967_v36, %v1827_v19  ;;  %v2325_v6 = vmax.f32 %v2246_v26, 0.0  ;;  %v2306_v47 = vadd.f32 %v3999_v14, %v3934_v30 }
 0x15f   : > { %v2069_v23 = vadd.f32 %v1969_v37, %v1828_v2  ;;  %2365 = vst [vmem:[%s4024_s17 + $0x40] sm:$0xff] %v2333_v31  ;;  %v2341_v40 = vmax.f32 %v2286_v0, 0.0  ;;  %v2268_v25 = vadd.f32 %v3999_v14, %v3959_v29  ;;  %v2248_v41 = vadd.f32 %v3999_v14, %v3961_v46 }
 0x160   : > { %v2104_v17 = vadd.f32 %v3880_v32, %v2068_v38  ;;  %2357 = vst [vmem:[%s4024_s17] sm:$0xff] %v2325_v6  ;;  %v2349_v30 = vmax.f32 %v2306_v47, 0.0  ;;  %v2288_v44 = vadd.f32 %v3999_v14, %v3965_v21  ;;  %v2308_v43 = vadd.f32 %v3999_v14, %v3967_v50  ;;  %v2292_v21 = vpop.f32.mrf.mxu2 }
 0x161   : > { %v2105_v1 = vadd.f32 %v3880_v32, %v2069_v23  ;;  %2373 = vst [vmem:[%s4024_s17 + $0x80] sm:$0xff] %v2341_v40  ;;  %v2334_v27 = vmax.f32 %v2268_v25, 0.0  ;;  %v2326_v29 = vmax.f32 %v2248_v41, 0.0  ;;  %v2271_v46 = vadd.f32 %v3999_v14, %v2270_v24 }
 0x162   : > { %v2136_v10 = vmax.f32 %v2104_v17, 0.0  ;;  %2381 = vst [vmem:[%s4024_s17 + $0xc0] sm:$0xff] %v2349_v30  ;;  %v2342_v34 = vmax.f32 %v2288_v44, 0.0  ;;  %v2350_v54 = vmax.f32 %v2308_v43, 0.0  ;;  %v2251_v33 = vadd.f32 %v3999_v14, %v2250_v9  ;;  %v2275_v3 = vpop.f32.mrf.mxu1 }
 0x163   : > { %v2137_v45 = vmax.f32 %v2105_v1, 0.0  ;;  %2366 = vst [vmem:[%s4024_s17 + $0x48] sm:$0xff] %v2334_v27  ;;  %v2335_v50 = vmax.f32 %v2271_v46, 0.0  ;;  %v2291_v32 = vadd.f32 %v3999_v14, %v2290_v56  ;;  %v2311_v49 = vadd.f32 %v3999_v14, %v2310_v4 }
 0x164   : > { %2358 = vst [vmem:[%s4024_s17 + $0x8] sm:$0xff] %v2326_v29  ;;  %v2327_v28 = vmax.f32 %v2251_v33, 0.0  ;;  %v2273_v18 = vadd.f32 %v3999_v14, %v2272_v7  ;;  %v2253_v16 = vadd.f32 %v3999_v14, %v2252_v60  ;;  %v2293_v55 = vadd.f32 %v3999_v14, %v2292_v21 }
 0x165   : > { %v2165_v15 = vpack.c.bf16 %v2137_v45, %v2136_v10  ;;  %2374 = vst [vmem:[%s4024_s17 + $0x88] sm:$0xff] %v2342_v34  ;;  %v2343_v11 = vmax.f32 %v2291_v32, 0.0  ;;  %v2351_v24 = vmax.f32 %v2311_v49, 0.0  ;;  %v2313_v9 = vadd.f32 %v3999_v14, %v2312_v39 }
 0x166   : > { %2382 = vst [vmem:[%s4024_s17 + $0xc8] sm:$0xff] %v2350_v54  ;;  %v2336_v12 = vmax.f32 %v2273_v18, 0.0  ;;  %v2328_v51 = vmax.f32 %v2253_v16, 0.0  ;;  %v2276_v59 = vadd.f32 %v3999_v14, %v2275_v3  ;;  %v2344_v62 = vmax.f32 %v2293_v55, 0.0 }
 0x167   : > { %2500 = vmatmul.msk.bf16.gmra.mxu0 %vm2183_vm4, %v2165_v15  ;;  %2367 = vst [vmem:[%s4024_s17 + $0x50] sm:$0xff] %v2335_v50  ;;  %v2352_v56 = vmax.f32 %v2313_v9, 0.0 }
 0x168   : > { %2359 = vst [vmem:[%s4024_s17 + $0x10] sm:$0xff] %v2327_v28  ;;  %v2337_v57 = vmax.f32 %v2276_v59, 0.0 }
 0x169   : > { %2375 = vst [vmem:[%s4024_s17 + $0x90] sm:$0xff] %v2343_v11 }
 0x16a   : > { %2383 = vst [vmem:[%s4024_s17 + $0xd0] sm:$0xff] %v2351_v24  ;;  %v2277_v48 = vpop.f32.mrf.mxu1 }
 0x16b   : > { %2368 = vst [vmem:[%s4024_s17 + $0x58] sm:$0xff] %v2336_v12  ;;  %v2278_v4 = vadd.f32 %v3999_v14, %v2277_v48 }
 0x16c   : > { %2360 = vst [vmem:[%s4024_s17 + $0x18] sm:$0xff] %v2328_v51 }
 0x16d   : > { %2376 = vst [vmem:[%s4024_s17 + $0x98] sm:$0xff] %v2344_v62  ;;  %v2338_v63 = vmax.f32 %v2278_v4, 0.0 }
 0x16e   : > { %2384 = vst [vmem:[%s4024_s17 + $0xd8] sm:$0xff] %v2352_v56 }
 0x16f   : > { %2369 = vst [vmem:[%s4024_s17 + $0x60] sm:$0xff] %v2337_v57 }
 0x170   : > { %2370 = vst [vmem:[%s4024_s17 + $0x68] sm:$0xff] %v2338_v63 }
 0x177   : > { %v2295_v53 = vpop.f32.mrf.mxu2 }
 0x178   : > { %v2296_v13 = vadd.f32 %v3999_v14, %v2295_v53 }
 0x17a   : > { %v2345_v20 = vmax.f32 %v2296_v13, 0.0 }
 0x17c   : > { %2377 = vst [vmem:[%s4024_s17 + $0xa0] sm:$0xff] %v2345_v20 }
 0x17f   : > { %v2297_v58 = vpop.f32.mrf.mxu2 }
 0x180   : > { %v2298_v8 = vadd.f32 %v3999_v14, %v2297_v58 }
 0x182   : > { %v2346_v22 = vmax.f32 %v2298_v8, 0.0 }
 0x184   : > { %2378 = vst [vmem:[%s4024_s17 + $0xa8] sm:$0xff] %v2346_v22 }
 0x18a   : > { %v2315_v61 = vpop.f32.mrf.mxu3 }
 0x18b   : > { %v2316_v5 = vadd.f32 %v3999_v14, %v2315_v61 }
 0x18d   : > { %v2353_v42 = vmax.f32 %v2316_v5, 0.0 }
 0x18f   : > { %2385 = vst [vmem:[%s4024_s17 + $0xe0] sm:$0xff] %v2353_v42 }
 0x192   : > { %v2317_v52 = vpop.f32.mrf.mxu3 }
 0x193   : > { %v2318_v19 = vadd.f32 %v3999_v14, %v2317_v52 }
 0x195   : > { %v2354_v35 = vmax.f32 %v2318_v19, 0.0 }
 0x197   : > { %2386 = vst [vmem:[%s4024_s17 + $0xe8] sm:$0xff] %v2354_v35 }
 0x198   : > { %v2255_v26 = vpop.f32.mrf.mxu0 }
 0x199   : > { %v2256_v2 = vadd.f32 %v3999_v14, %v2255_v26 }
 0x19b   : > { %v2329_v36 = vmax.f32 %v2256_v2, 0.0 }
 0x19d   : > { %2361 = vst [vmem:[%s4024_s17 + $0x20] sm:$0xff] %v2329_v36 }
 0x1a0   : > { %v2257_v31 = vpop.f32.mrf.mxu0 }
 0x1a1   : > { %v2258_v0 = vadd.f32 %v3999_v14, %v2257_v31 }
 0x1a3   : > { %v2330_v37 = vmax.f32 %v2258_v0, 0.0 }
 0x1a5   : > { %2362 = vst [vmem:[%s4024_s17 + $0x28] sm:$0xff] %v2330_v37 }
 0x1aa   : > { %v2280_v38 = vpop.f32.mrf.mxu1 }
 0x1ab   : > { %v2281_v6 = vadd.f32 %v3999_v14, %v2280_v38 }
 0x1ad   : > { %v2339_v47 = vmax.f32 %v2281_v6, 0.0 }
 0x1af   : > { %2371 = vst [vmem:[%s4024_s17 + $0x70] sm:$0xff] %v2339_v47 }
 0x1b2   : > { %v2282_v25 = vpop.f32.mrf.mxu1 }
 0x1b3   : > { %v2283_v41 = vadd.f32 %v3999_v14, %v2282_v25 }
 0x1b5   : > { %v2340_v17 = vmax.f32 %v2283_v41, 0.0 }
 0x1b7   : > { %2372 = vst [vmem:[%s4024_s17 + $0x78] sm:$0xff] %v2340_v17 }
 0x1c3   : > { %v2300_v23 = vpop.f32.mrf.mxu2 }
 0x1c4   : > { %v2301_v40 = vadd.f32 %v3999_v14, %v2300_v23 }
 0x1c6   : > { %v2347_v7 = vmax.f32 %v2301_v40, 0.0 }
 0x1c8   : > { %2379 = vst [vmem:[%s4024_s17 + $0xb0] sm:$0xff] %v2347_v7 }
 0x1cb   : > { %v2302_v30 = vpop.f32.mrf.mxu2 }
 0x1cc   : > { %v2303_v44 = vadd.f32 %v3999_v14, %v2302_v30 }
 0x1ce   : > { %v2348_v43 = vmax.f32 %v2303_v44, 0.0 }
 0x1d0   : > { %2380 = vst [vmem:[%s4024_s17 + $0xb8] sm:$0xff] %v2348_v43 }
 0x1d7   : > { %v2320_v1 = vpop.f32.mrf.mxu3 }
 0x1d8   : > { %v2321_v27 = vadd.f32 %v3999_v14, %v2320_v1 }
 0x1da   : > { %v2355_v29 = vmax.f32 %v2321_v27, 0.0 }
 0x1dc   : > { %2387 = vst [vmem:[%s4024_s17 + $0xf0] sm:$0xff] %v2355_v29 }
 0x1df   : > { %v2322_v46 = vpop.f32.mrf.mxu3 }
 0x1e0   : > { %v2323_v60 = vadd.f32 %v3999_v14, %v2322_v46 }
 0x1e2   : > { %v2356_v10 = vmax.f32 %v2323_v60, 0.0 }
 0x1e4   : > { %v2260_v34 = vpop.f32.mrf.mxu0  ;;  %2388 = vst [vmem:[%s4024_s17 + $0xf8] sm:$0xff] %v2356_v10 }
 0x1e5   : > { %v2261_v54 = vadd.f32 %v3999_v14, %v2260_v34 }
 0x1e7   : > { %v2331_v33 = vmax.f32 %v2261_v54, 0.0 }
 0x1e9   : > { %2363 = vst [vmem:[%s4024_s17 + $0x30] sm:$0xff] %v2331_v33 }
 0x1ec   : > { %v2262_v21 = vpop.f32.mrf.mxu0 }
 0x1ed   : > { %v2263_v45 = vadd.f32 %v3999_v14, %v2262_v21 }
 0x1ef   : > { %v2332_v50 = vmax.f32 %v2263_v45, 0.0 }
 0x1f1   : > { %2364 = vst [vmem:[%s4024_s17 + $0x38] sm:$0xff] %v2332_v50 }
 0x1f2   : > { %2614 = shalt.err (!%p2611_p5)
}
 0x1f3   : > { %s2667_s13 = smov 128   ;;  %s2668_s17 = smov 8  }
 0x1f4   : > { %2523 = dma.vmem_to_hbm [thread:$0]  (%p2739_p4), %s2406_s7, 4096, %s2408_s8, %s2390_s9, %s2667_s13, %s2667_s13, %s2668_s17  }
 0x1f5 PF: > { %p2529_p6 = scmp.ge.s32.totalorder %s2665_s23, 2  ;;  %s2422_s24 = sand.u32 1, %s2645_s18  }
 0x1f6   : > { %s2423_s25 = scalar_lea.sflag [#allocation3], %s2422_s24 }
 0x1f7   : > { %p2526_p7 = pnand %p2529_p6, %p2746_p8 }
 0x1f9   : > { %p2527_p9 = pneg %p2526_p7 }
 0x1fb   : > { %2640 = dma.done.wait (%p2527_p9), %s2423_s25, 4096  }
 0x1fc   : > { %2642 = vsyncadd (%p2527_p9), %s2423_s25, 4294963200  ;;  %s18_s23 = sadd.s32 1, %s2665_s23   ;;  %s4196_s18 = smov %s2649_s19 }
 0x1fd   : > { %p15_p10 = scmp.ge.s32.totalorder %s18_s23, 4   ;;  %s4197_s19 = smov %s2653_s20 }
 0x1fe   : > { %s4198_s20 = smov %s2752_s6  ;;  %s4199_s21 = smov %s2661_s22 }
 0x1ff   : > { %s4200_s22 = smov %s4202_s26  ;;  %17 = sbr.rel (!%p15_p10) target bundleno = 4 (0x4), region = 78 }
 0x204   :  { %2429 = vsyncpa [#allocation3], 1 }
 0x205   :  { %2431 = vsyncpa [#allocation3 + $0x1], 1 }

</bundles_post_ra>
